<compile_context>
chip_gen: v6e
topology: v6e:2x2x1
jax: 0.10.0
libtpu: 0.0.40
codegen_flags: <defaults>
</compile_context>

<pallas_src>
import functools

import jax
import jax.numpy as jnp
import numpy as np
from jax import lax
from jax.experimental import pallas as pl
from jax.experimental.pallas import tpu as pltpu

# Deterministic module "hyper-parameters" (would come from config in PyTorch).
PC_RANGE = (-50.0, -50.0, -5.0, 50.0, 50.0, 3.0)
SCALE_RANGE = (0.1, 0.1, 0.1, 2.0, 2.0, 2.0)
EPS = 1e-5


# --------------------------------------------------------------------------
# Fused kernel.
# Grid = (B, G//tile_g, Ncam, HW//tile_hw); camera and HW-chunk are innermost
# "arbitrary" (reduction) axes; both outputs are resident across them.
# --------------------------------------------------------------------------
def _gaussian_sampling_kernel(
        gauss_ref,       # (tG, 10)          f32 VMEM
        noise_ref,       # (tG, 3*P)         f32 VMEM  columns j*P + p
        l2i_ref,         # (B*Ncam*16,)      f32 SMEM  flat row-major 4x4
        feat_ref,        # (C, tile_hw)      bf16 VMEM one camera / HW chunk
        feats_out_ref,   # (P, tG, C)        f32 VMEM  resident accumulator
        pts_out_ref,     # (tG, 3*P)         f32 VMEM  resident, columns j*P+p
        *, P, fh, fw, img_h, img_w, num_cams, compute_dtype):
    b = pl.program_id(0)
    cam = pl.program_id(2)
    hw_i = pl.program_id(3)
    C, tile_hw = feat_ref.shape
    tG = gauss_ref.shape[0]

    # ---- once per (batch, gaussian tile): decode gaussians, draw samples ----
    @pl.when((cam == 0) & (hw_i == 0))
    def _init():
        g = gauss_ref[...]
        pc, sc = PC_RANGE, SCALE_RANGE
        mean0 = g[:, 0:1] * (pc[3] - pc[0]) + pc[0]
        mean1 = g[:, 1:2] * (pc[4] - pc[1]) + pc[1]
        mean2 = g[:, 2:3] * (pc[5] - pc[2]) + pc[2]
        s0 = jax.nn.sigmoid(g[:, 3:4]) * (sc[3] - sc[0]) + sc[0]
        s1 = jax.nn.sigmoid(g[:, 4:5]) * (sc[4] - sc[1]) + sc[1]
        s2 = jax.nn.sigmoid(g[:, 5:6]) * (sc[5] - sc[2]) + sc[2]
        qw, qx, qy, qz = g[:, 6:7], g[:, 7:8], g[:, 8:9], g[:, 9:10]
        qn = jnp.maximum(jnp.sqrt(qw * qw + qx * qx + qy * qy + qz * qz), 1e-12)
        qw, qx, qy, qz = qw / qn, qx / qn, qy / qn, qz / qn
        r00 = 1.0 - 2.0 * (qy * qy + qz * qz)
        r01 = 2.0 * (qx * qy - qz * qw)
        r02 = 2.0 * (qx * qz + qy * qw)
        r10 = 2.0 * (qx * qy + qz * qw)
        r11 = 1.0 - 2.0 * (qx * qx + qz * qz)
        r12 = 2.0 * (qy * qz - qx * qw)
        r20 = 2.0 * (qx * qz - qy * qw)
        r21 = 2.0 * (qy * qz + qx * qw)
        r22 = 1.0 - 2.0 * (qx * qx + qy * qy)
        # M = R @ diag(s); mean + M z has the same law as mean + chol(MM^T) z,
        # so the analytic Cholesky (and its sqrt(<0) risk) is dropped.
        z0 = noise_ref[:, 0 * P:1 * P]                       # (tG, P)
        z1 = noise_ref[:, 1 * P:2 * P]
        z2 = noise_ref[:, 2 * P:3 * P]
        px = mean0 + (r00 * s0) * z0 + (r01 * s1) * z1 + (r02 * s2) * z2
        py = mean1 + (r10 * s0) * z0 + (r11 * s1) * z1 + (r12 * s2) * z2
        pz = mean2 + (r20 * s0) * z0 + (r21 * s1) * z1 + (r22 * s2) * z2
        pts_out_ref[...] = jnp.concatenate([px, py, pz], axis=1)  # one store
        feats_out_ref[...] = jnp.zeros_like(feats_out_ref)

    # ---- every (camera, HW chunk): SMEM-scalar projection + bilinear weights
    X = pts_out_ref[:, 0 * P:1 * P]                          # (tG, P)
    Y = pts_out_ref[:, 1 * P:2 * P]
    Z = pts_out_ref[:, 2 * P:3 * P]

    base = (b * num_cams + cam) * 16

    def m(r, c):
        return l2i_ref[base + 4 * r + c]                     # SMEM scalar

    proj0 = m(0, 0) * X + m(0, 1) * Y + m(0, 2) * Z + m(0, 3)
    proj1 = m(1, 0) * X + m(1, 1) * Y + m(1, 2) * Z + m(1, 3)
    proj2 = m(2, 0) * X + m(2, 1) * Y + m(2, 2) * Z + m(2, 3)

    homo_nz = jnp.maximum(proj2, EPS)
    u = proj0 / (homo_nz * img_w)
    v = proj1 / (homo_nz * img_h)
    vf = ((proj2 > EPS) & (u > 0.0) & (u < 1.0)
          & (v > 0.0) & (v < 1.0)).astype(jnp.float32)

    # grid_sample semantics: align_corners=False, padding_mode='zeros'
    x = u * fw - 0.5
    y = v * fh - 0.5
    x0f = jnp.floor(x)
    y0f = jnp.floor(y)
    wx = x - x0f
    wy = y - y0f
    x0 = x0f.astype(jnp.int32)
    y0 = y0f.astype(jnp.int32)
    x1 = x0 + 1
    y1 = y0 + 1

    in_x0 = (x0 >= 0).astype(jnp.float32)
    in_x1 = (x1 < fw).astype(jnp.float32)
    in_y0 = (y0 >= 0).astype(jnp.float32)
    in_y1 = (y1 < fh).astype(jnp.float32)

    # Every corner weight carries its own validity mask, so an out-of-image /
    # out-of-frustum corner index may point anywhere: its weight is zero.
    w00 = ((1.0 - wx) * (1.0 - wy) * vf * in_x0 * in_y0).astype(compute_dtype)
    w10 = (wx * (1.0 - wy) * vf * in_x1 * in_y0).astype(compute_dtype)
    w01 = ((1.0 - wx) * wy * vf * in_x0 * in_y1).astype(compute_dtype)
    w11 = (wx * wy * vf * in_x1 * in_y1).astype(compute_dtype)
    idx00 = y0 * fw + x0                                     # (tG, P) int32

    # Chunk-global pixel index per lane; corners in other chunks simply never
    # match -> no halo / wrap handling needed at chunk boundaries.
    hw_start = hw_i * tile_hw
    lane = lax.broadcasted_iota(jnp.int32, (1, tile_hw), 1) + hw_start

    slabs = []
    for p in range(P):                                       # static, small
        i00 = idx00[:, p:p + 1]                              # (tG, 1)
        wp = (w00[:, p:p + 1] * (lane == i00).astype(compute_dtype)
              + w10[:, p:p + 1] * (lane == i00 + 1).astype(compute_dtype)
              + w01[:, p:p + 1] * (lane == i00 + fw).astype(compute_dtype)
              + w11[:, p:p + 1] * (lane == i00 + fw + 1).astype(compute_dtype))
        slabs.append(wp)                                     # (tG, tile_hw)

    # One stacked MXU matmul per (camera, chunk): (P*tG, tile_hw) x (tile_hw, C)
    wmat = jnp.concatenate(slabs, axis=0).astype(jnp.bfloat16)
    res = lax.dot_general(
        wmat, feat_ref[...],
        dimension_numbers=(((1,), (1,)), ((), ())),
        preferred_element_type=jnp.float32)                  # (P*tG, C) f32

    # Accumulate directly into the resident output block (no scratch copy).
    for p in range(P):
        feats_out_ref[p, :, :] += res[p * tG:(p + 1) * tG]


def _pick_gaussian_tile(G, max_tile=256):
    if G <= max_tile:
        return G
    for t in range(max_tile, 7, -1):
        if G % t == 0 and t % 8 == 0:
            return t
    return G


def _pick_hw_tile(HW, target=2048):
    if HW % 128 != 0:
        return HW                       # full level (block == full dim is legal)
    best, t = 128, 128
    while t <= min(target, HW):
        if HW % t == 0:
            best = t
        t += 128
    return best


# --------------------------------------------------------------------------
# Full forward (mirrors GaussianCrossAttention.forward).
# --------------------------------------------------------------------------
def gaussian_cross_attention(mlvl_feats, lidar2img, gaussians, noise, *,
                             num_sampled_points, img_h, img_w,
                             tile_g=None, tile_hw=None,
                             compute_dtype=jnp.bfloat16):
    """
    mlvl_feats: (B, Ncam, C, H, W) float32  (single FPN level, PyTorch NCHW)
    lidar2img : (B, Ncam, 4, 4)    float32
    gaussians : (B, G, 10)         float32  [mean(3), scale-logit(3), quat(4)]
    noise     : (B, G, 3, P)       float32  standard normals (external RNG)
    returns (sampled_feats (B, G, P, C), sampled_points (B, G, 1, P, 3))
    compute_dtype: bf16 for v6e/v7x (default); pass jnp.float32 on v5e.
    """
    B, G, _ = gaussians.shape
    P = num_sampled_points
    assert noise.shape == (B, G, 3, P)
    Bf, Ncam, C, H, W = mlvl_feats.shape
    assert Bf == B
    HW = H * W

    if tile_g is None:
        tile_g = _pick_gaussian_tile(G)
    if tile_hw is None:
        tile_hw = _pick_hw_tile(HW)
    assert G % tile_g == 0 and (tile_g % 8 == 0 or tile_g == G)
    assert HW % tile_hw == 0 and (tile_hw % 128 == 0 or tile_hw == HW)

    # NCHW kept (reshape only, no transpose); bf16 halves feat VMEM/DMA.
    feats = mlvl_feats.reshape(B, Ncam, C, HW).astype(jnp.bfloat16)
    noise_flat = noise.reshape(B, G, 3 * P)
    l2i_flat = lidar2img.reshape(-1)                         # 1-D -> no SMEM pad

    kernel = functools.partial(
        _gaussian_sampling_kernel,
        P=P, fh=H, fw=W, img_h=float(img_h), img_w=float(img_w),
        num_cams=Ncam, compute_dtype=compute_dtype)

    # Explicit scoped-VMEM limit sized from the real buffer budget.
    est = (2 * C * tile_hw * 2                               # feat double-buffer
           + 2 * tile_g * (10 + 3 * P) * 4                   # gauss + noise
           + 2 * (P * tile_g * C + tile_g * 3 * P) * 4       # output blocks
           + 3 * P * tile_g * tile_hw * 2)                   # wmat build temps
    vmem_limit = int(min(max(3 * est, 32 * 2 ** 20), 100 * 2 ** 20))

    feats_out, pts_out = pl.pallas_call(
        kernel,
        out_shape=(jax.ShapeDtypeStruct((B, P, G, C), jnp.float32),
                   jax.ShapeDtypeStruct((B, G, 3 * P), jnp.float32)),
        grid_spec=pltpu.PrefetchScalarGridSpec(
            num_scalar_prefetch=0,
            grid=(B, G // tile_g, Ncam, HW // tile_hw),
            in_specs=[
                pl.BlockSpec((None, tile_g, 10),
                             lambda bi, gi, ci, hi: (bi, gi, 0)),
                pl.BlockSpec((None, tile_g, 3 * P),
                             lambda bi, gi, ci, hi: (bi, gi, 0)),
                pl.BlockSpec(memory_space=pltpu.MemorySpace.SMEM),
                pl.BlockSpec((None, None, C, tile_hw),
                             lambda bi, gi, ci, hi: (bi, ci, 0, hi)),
            ],
            out_specs=[
                pl.BlockSpec((None, P, tile_g, C),
                             lambda bi, gi, ci, hi: (bi, 0, gi, 0)),
                pl.BlockSpec((None, tile_g, 3 * P),
                             lambda bi, gi, ci, hi: (bi, gi, 0)),
            ],
        ),
        compiler_params=pltpu.CompilerParams(
            dimension_semantics=("parallel", "parallel",
                                 "arbitrary", "arbitrary"),
            vmem_limit_bytes=vmem_limit),
    )(gaussians, noise_flat, l2i_flat, feats)

    sampled_feats = jnp.transpose(feats_out, (0, 2, 1, 3))           # (B,G,P,C)
    pts = jnp.transpose(pts_out.reshape(B, G, 3, P), (0, 1, 3, 2))   # (B,G,P,3)
    sampled_points = pts[:, :, None, :, :]                           # (B,G,1,P,3)
    return sampled_feats, sampled_points


# --------------------------------------------------------------------------
# Pure-JAX reference (mirrors kernel semantics) for correctness checking.
# --------------------------------------------------------------------------
def reference_forward(mlvl_feats, lidar2img, gaussians, noise, *,
                      num_sampled_points, img_h, img_w):
    B, G, _ = gaussians.shape
    P = num_sampled_points
    _, Ncam, C, H, W = mlvl_feats.shape
    HW = H * W
    pc, sc = PC_RANGE, SCALE_RANGE
    g = gaussians

    def col(a):
        return a[..., None]

    mean0 = g[..., 0] * (pc[3] - pc[0]) + pc[0]
    mean1 = g[..., 1] * (pc[4] - pc[1]) + pc[1]
    mean2 = g[..., 2] * (pc[5] - pc[2]) + pc[2]
    s0 = jax.nn.sigmoid(g[..., 3]) * (sc[3] - sc[0]) + sc[0]
    s1 = jax.nn.sigmoid(g[..., 4]) * (sc[4] - sc[1]) + sc[1]
    s2 = jax.nn.sigmoid(g[..., 5]) * (sc[5] - sc[2]) + sc[2]
    qw, qx, qy, qz = g[..., 6], g[..., 7], g[..., 8], g[..., 9]
    qn = jnp.maximum(jnp.sqrt(qw * qw + qx * qx + qy * qy + qz * qz), 1e-12)
    qw, qx, qy, qz = qw / qn, qx / qn, qy / qn, qz / qn
    r00 = 1 - 2 * (qy * qy + qz * qz); r01 = 2 * (qx * qy - qz * qw); r02 = 2 * (qx * qz + qy * qw)
    r10 = 2 * (qx * qy + qz * qw); r11 = 1 - 2 * (qx * qx + qz * qz); r12 = 2 * (qy * qz - qx * qw)
    r20 = 2 * (qx * qz - qy * qw); r21 = 2 * (qy * qz + qx * qw); r22 = 1 - 2 * (qx * qx + qy * qy)
    z0, z1, z2 = noise[:, :, 0, :], noise[:, :, 1, :], noise[:, :, 2, :]       # (B,G,P)
    px = col(mean0) + col(r00 * s0) * z0 + col(r01 * s1) * z1 + col(r02 * s2) * z2
    py = col(mean1) + col(r10 * s0) * z0 + col(r11 * s1) * z1 + col(r12 * s2) * z2
    pz = col(mean2) + col(r20 * s0) * z0 + col(r21 * s1) * z1 + col(r22 * s2) * z2
    pts = jnp.stack([px, py, pz], axis=-1)                                     # (B,G,P,3)

    feat = mlvl_feats.astype(jnp.bfloat16).astype(jnp.float32).reshape(B, Ncam, C, HW)
    N = G * P
    Xf, Yf, Zf = px.reshape(B, 1, N), py.reshape(B, 1, N), pz.reshape(B, 1, N)
    L = lidar2img
    proj0 = L[..., 0, 0:1] * Xf + L[..., 0, 1:2] * Yf + L[..., 0, 2:3] * Zf + L[..., 0, 3:4]
    proj1 = L[..., 1, 0:1] * Xf + L[..., 1, 1:2] * Yf + L[..., 1, 2:3] * Zf + L[..., 1, 3:4]
    proj2 = L[..., 2, 0:1] * Xf + L[..., 2, 1:2] * Yf + L[..., 2, 2:3] * Zf + L[..., 2, 3:4]
    homo_nz = jnp.maximum(proj2, EPS)
    u = proj0 / (homo_nz * img_w)
    v = proj1 / (homo_nz * img_h)
    vf = ((proj2 > EPS) & (u > 0.0) & (u < 1.0) & (v > 0.0) & (v < 1.0)).astype(jnp.float32)
    x = u * W - 0.5
    y = v * H - 0.5
    x0 = jnp.floor(x); y0 = jnp.floor(y)
    wx = x - x0; wy = y - y0
    x0 = x0.astype(jnp.int32); y0 = y0.astype(jnp.int32)
    x1 = x0 + 1; y1 = y0 + 1

    def corner(xi, yi, w):
        inb = ((xi >= 0) & (xi < W) & (yi >= 0) & (yi < H)).astype(jnp.float32)
        # Mirror the kernel's bf16 wmat build (single bf16 round of the weight).
        wq = (w * inb * vf).astype(jnp.bfloat16).astype(jnp.float32)           # (B,Ncam,N)
        idx = jnp.clip(yi * W + xi, 0, HW - 1)
        idx_e = jnp.broadcast_to(idx[:, :, None, :], (B, Ncam, C, N))
        return jnp.take_along_axis(feat, idx_e, axis=-1) * wq[:, :, None, :]

    sampled = (corner(x0, y0, (1 - wx) * (1 - wy))
               + corner(x1, y0, wx * (1 - wy))
               + corner(x0, y1, (1 - wx) * wy)
               + corner(x1, y1, wx * wy)).sum(axis=1)                          # (B,C,N)
    sampled_feats = jnp.transpose(sampled.reshape(B, C, G, P), (0, 2, 3, 1))
    return sampled_feats, pts


if __name__ == "__main__":
    B, G, P = 2, 8, 8          # batch, num gaussians, num_sampled_points
    C = 32                     # embed_dims
    Ncam = 2
    H = W = 16                 # img_h = img_w = feature map size

    key = jax.random.PRNGKey(0)
    k1, k2, k3 = jax.random.split(key, 3)
    gaussians = jax.random.uniform(k1, (B, G, 10), dtype=jnp.float32)
    mlvl_feats = jax.random.normal(k2, (B, Ncam, C, H, W), dtype=jnp.float32)
    noise = jax.random.normal(k3, (B, G, 3, P), dtype=jnp.float32)

    # Deterministic simple pinhole cameras looking along +x (depth = x + t).
    def make_cam(f, cx, cy, t):
        return jnp.array([[cx, f, 0.0, t * cx],
                          [cy, 0.0, f, t * cy],
                          [1.0, 0.0, 0.0, t],
                          [0.0, 0.0, 0.0, 1.0]], dtype=jnp.float32)

    cams = jnp.stack([make_cam(2.0, 8.0, 8.0, 60.0),
                      make_cam(2.5, 8.0, 8.0, 55.0)], axis=0)  # (Ncam, 4, 4)
    lidar2img = jnp.broadcast_to(cams[None], (B, Ncam, 4, 4))

    # tile_hw=128 < HW=256 deliberately exercises the HW-chunking path.
    fwd = jax.jit(functools.partial(gaussian_cross_attention,
                                    num_sampled_points=P, img_h=H, img_w=W,
                                    tile_hw=128))
    sampled_feats, sampled_points = fwd(mlvl_feats, lidar2img, gaussians, noise)
    jax.block_until_ready((sampled_feats, sampled_points))

    assert sampled_feats.shape == (B, G, P, C)
    assert sampled_points.shape == (B, G, 1, P, 3)

    ref_feats, ref_pts = reference_forward(
        mlvl_feats, lidar2img, gaussians, noise,
        num_sampled_points=P, img_h=H, img_w=W)
    np.testing.assert_allclose(np.asarray(sampled_points[:, :, 0]),
                               np.asarray(ref_pts), rtol=1e-3, atol=1e-3)
    np.testing.assert_allclose(np.asarray(sampled_feats),
                               np.asarray(ref_feats), rtol=5e-2, atol=5e-2)
    print("KERNEL_OK")
</pallas_src>

<mosaic_0001>
module attributes {stable_mosaic.version = 11 : i64} {
  func.func @_gaussian_sampling_kernel(%arg0: i32, %arg1: i32, %arg2: i32, %arg3: i32, %arg4: memref<1x8x10xf32, #tpu.memory_space<vmem>>, %arg5: memref<1x8x24xf32, #tpu.memory_space<vmem>>, %arg6: memref<64xf32, #tpu.memory_space<smem>>, %arg7: memref<1x1x32x128xbf16, #tpu.memory_space<vmem>>, %arg8: memref<1x8x8x32xf32, #tpu.memory_space<vmem>>, %arg9: memref<1x8x24xf32, #tpu.memory_space<vmem>>) attributes {dimension_semantics = [#tpu.dimension_semantics<parallel>, #tpu.dimension_semantics<parallel>, #tpu.dimension_semantics<arbitrary>, #tpu.dimension_semantics<arbitrary>], iteration_bounds = array<i64: 2, 1, 2, 2>, scalar_prefetch = 0 : i64, scratch_operands = 0 : i64, tpu.core_type = #tpu.core_type<tc>, window_params = [{transform_indices = @transform_0, window_bounds = array<i64: 1, 8, 10>}, {transform_indices = @transform_1, window_bounds = array<i64: 1, 8, 24>}, {transform_indices = @transform_2, window_bounds = array<i64: 64>}, {transform_indices = @transform_3, window_bounds = array<i64: 1, 1, 32, 128>}, {transform_indices = @transform_4, window_bounds = array<i64: 1, 8, 8, 32>}, {transform_indices = @transform_5, window_bounds = array<i64: 1, 8, 24>}]} {
    %c0_i32 = arith.constant 0 : i32
    %0 = arith.cmpi eq, %arg2, %c0_i32 : i32
    %c0_i32_0 = arith.constant 0 : i32
    %1 = arith.cmpi eq, %arg3, %c0_i32_0 : i32
    %2 = arith.andi %0, %1 : i1
    %3 = arith.extui %2 : i1 to i32
    %c0_i32_1 = arith.constant 0 : i32
    %4 = arith.cmpi ne, %3, %c0_i32_1 : i32
    scf.if %4 {
      %c0_144 = arith.constant 0 : index
      %c0_145 = arith.constant 0 : index
      %c0_146 = arith.constant 0 : index
      %629 = vector.load %arg4[%c0_144, %c0_145, %c0_146] : memref<1x8x10xf32, #tpu.memory_space<vmem>>, vector<1x8x10xf32>
      %630 = vector.shape_cast %629 : vector<1x8x10xf32> to vector<8x10xf32>
      %631 = vector.extract_strided_slice %630 {offsets = [0, 0], sizes = [8, 1], strides = [1, 1]} : vector<8x10xf32> to vector<8x1xf32>
      %cst_147 = arith.constant 1.000000e+02 : f32
      %632 = vector.broadcast %cst_147 : f32 to vector<8x1xf32>
      %633 = arith.mulf %631, %632 : vector<8x1xf32>
      %cst_148 = arith.constant -5.000000e+01 : f32
      %634 = vector.broadcast %cst_148 : f32 to vector<8x1xf32>
      %635 = arith.addf %633, %634 : vector<8x1xf32>
      %636 = vector.extract_strided_slice %630 {offsets = [0, 1], sizes = [8, 1], strides = [1, 1]} : vector<8x10xf32> to vector<8x1xf32>
      %cst_149 = arith.constant 1.000000e+02 : f32
      %637 = vector.broadcast %cst_149 : f32 to vector<8x1xf32>
      %638 = arith.mulf %636, %637 : vector<8x1xf32>
      %cst_150 = arith.constant -5.000000e+01 : f32
      %639 = vector.broadcast %cst_150 : f32 to vector<8x1xf32>
      %640 = arith.addf %638, %639 : vector<8x1xf32>
      %641 = vector.extract_strided_slice %630 {offsets = [0, 2], sizes = [8, 1], strides = [1, 1]} : vector<8x10xf32> to vector<8x1xf32>
      %cst_151 = arith.constant 8.000000e+00 : f32
      %642 = vector.broadcast %cst_151 : f32 to vector<8x1xf32>
      %643 = arith.mulf %641, %642 : vector<8x1xf32>
      %cst_152 = arith.constant -5.000000e+00 : f32
      %644 = vector.broadcast %cst_152 : f32 to vector<8x1xf32>
      %645 = arith.addf %643, %644 : vector<8x1xf32>
      %646 = vector.extract_strided_slice %630 {offsets = [0, 3], sizes = [8, 1], strides = [1, 1]} : vector<8x10xf32> to vector<8x1xf32>
      %647 = arith.negf %646 : vector<8x1xf32>
      %648 = math.exp %647 : vector<8x1xf32>
      %cst_153 = arith.constant 1.000000e+00 : f32
      %649 = vector.broadcast %cst_153 : f32 to vector<8x1xf32>
      %650 = arith.addf %649, %648 : vector<8x1xf32>
      %651 = arith.divf %649, %650 : vector<8x1xf32>
      %cst_154 = arith.constant 1.900000e+00 : f32
      %652 = vector.broadcast %cst_154 : f32 to vector<8x1xf32>
      %653 = arith.mulf %651, %652 : vector<8x1xf32>
      %cst_155 = arith.constant 1.000000e-01 : f32
      %654 = vector.broadcast %cst_155 : f32 to vector<8x1xf32>
      %655 = arith.addf %653, %654 : vector<8x1xf32>
      %656 = vector.extract_strided_slice %630 {offsets = [0, 4], sizes = [8, 1], strides = [1, 1]} : vector<8x10xf32> to vector<8x1xf32>
      %657 = arith.negf %656 : vector<8x1xf32>
      %658 = math.exp %657 : vector<8x1xf32>
      %cst_156 = arith.constant 1.000000e+00 : f32
      %659 = vector.broadcast %cst_156 : f32 to vector<8x1xf32>
      %660 = arith.addf %659, %658 : vector<8x1xf32>
      %661 = arith.divf %659, %660 : vector<8x1xf32>
      %cst_157 = arith.constant 1.900000e+00 : f32
      %662 = vector.broadcast %cst_157 : f32 to vector<8x1xf32>
      %663 = arith.mulf %661, %662 : vector<8x1xf32>
      %cst_158 = arith.constant 1.000000e-01 : f32
      %664 = vector.broadcast %cst_158 : f32 to vector<8x1xf32>
      %665 = arith.addf %663, %664 : vector<8x1xf32>
      %666 = vector.extract_strided_slice %630 {offsets = [0, 5], sizes = [8, 1], strides = [1, 1]} : vector<8x10xf32> to vector<8x1xf32>
      %667 = arith.negf %666 : vector<8x1xf32>
      %668 = math.exp %667 : vector<8x1xf32>
      %cst_159 = arith.constant 1.000000e+00 : f32
      %669 = vector.broadcast %cst_159 : f32 to vector<8x1xf32>
      %670 = arith.addf %669, %668 : vector<8x1xf32>
      %671 = arith.divf %669, %670 : vector<8x1xf32>
      %cst_160 = arith.constant 1.900000e+00 : f32
      %672 = vector.broadcast %cst_160 : f32 to vector<8x1xf32>
      %673 = arith.mulf %671, %672 : vector<8x1xf32>
      %cst_161 = arith.constant 1.000000e-01 : f32
      %674 = vector.broadcast %cst_161 : f32 to vector<8x1xf32>
      %675 = arith.addf %673, %674 : vector<8x1xf32>
      %676 = vector.extract_strided_slice %630 {offsets = [0, 6], sizes = [8, 1], strides = [1, 1]} : vector<8x10xf32> to vector<8x1xf32>
      %677 = vector.extract_strided_slice %630 {offsets = [0, 7], sizes = [8, 1], strides = [1, 1]} : vector<8x10xf32> to vector<8x1xf32>
      %678 = vector.extract_strided_slice %630 {offsets = [0, 8], sizes = [8, 1], strides = [1, 1]} : vector<8x10xf32> to vector<8x1xf32>
      %679 = vector.extract_strided_slice %630 {offsets = [0, 9], sizes = [8, 1], strides = [1, 1]} : vector<8x10xf32> to vector<8x1xf32>
      %680 = arith.mulf %676, %676 : vector<8x1xf32>
      %681 = arith.mulf %677, %677 : vector<8x1xf32>
      %682 = arith.addf %680, %681 : vector<8x1xf32>
      %683 = arith.mulf %678, %678 : vector<8x1xf32>
      %684 = arith.addf %682, %683 : vector<8x1xf32>
      %685 = arith.mulf %679, %679 : vector<8x1xf32>
      %686 = arith.addf %684, %685 : vector<8x1xf32>
      %687 = math.sqrt %686 : vector<8x1xf32>
      %cst_162 = arith.constant 9.99999996E-13 : f32
      %688 = vector.broadcast %cst_162 : f32 to vector<8x1xf32>
      %689 = arith.maximumf %687, %688 : vector<8x1xf32>
      %690 = arith.divf %676, %689 : vector<8x1xf32>
      %691 = arith.divf %677, %689 : vector<8x1xf32>
      %692 = arith.divf %678, %689 : vector<8x1xf32>
      %693 = arith.divf %679, %689 : vector<8x1xf32>
      %694 = arith.mulf %692, %692 : vector<8x1xf32>
      %695 = arith.mulf %693, %693 : vector<8x1xf32>
      %696 = arith.addf %694, %695 : vector<8x1xf32>
      %cst_163 = arith.constant 2.000000e+00 : f32
      %697 = vector.broadcast %cst_163 : f32 to vector<8x1xf32>
      %698 = arith.mulf %697, %696 : vector<8x1xf32>
      %cst_164 = arith.constant 1.000000e+00 : f32
      %699 = vector.broadcast %cst_164 : f32 to vector<8x1xf32>
      %700 = arith.subf %699, %698 : vector<8x1xf32>
      %701 = arith.mulf %691, %692 : vector<8x1xf32>
      %702 = arith.mulf %693, %690 : vector<8x1xf32>
      %703 = arith.subf %701, %702 : vector<8x1xf32>
      %cst_165 = arith.constant 2.000000e+00 : f32
      %704 = vector.broadcast %cst_165 : f32 to vector<8x1xf32>
      %705 = arith.mulf %704, %703 : vector<8x1xf32>
      %706 = arith.mulf %691, %693 : vector<8x1xf32>
      %707 = arith.mulf %692, %690 : vector<8x1xf32>
      %708 = arith.addf %706, %707 : vector<8x1xf32>
      %cst_166 = arith.constant 2.000000e+00 : f32
      %709 = vector.broadcast %cst_166 : f32 to vector<8x1xf32>
      %710 = arith.mulf %709, %708 : vector<8x1xf32>
      %711 = arith.mulf %691, %692 : vector<8x1xf32>
      %712 = arith.mulf %693, %690 : vector<8x1xf32>
      %713 = arith.addf %711, %712 : vector<8x1xf32>
      %cst_167 = arith.constant 2.000000e+00 : f32
      %714 = vector.broadcast %cst_167 : f32 to vector<8x1xf32>
      %715 = arith.mulf %714, %713 : vector<8x1xf32>
      %716 = arith.mulf %691, %691 : vector<8x1xf32>
      %717 = arith.mulf %693, %693 : vector<8x1xf32>
      %718 = arith.addf %716, %717 : vector<8x1xf32>
      %cst_168 = arith.constant 2.000000e+00 : f32
      %719 = vector.broadcast %cst_168 : f32 to vector<8x1xf32>
      %720 = arith.mulf %719, %718 : vector<8x1xf32>
      %cst_169 = arith.constant 1.000000e+00 : f32
      %721 = vector.broadcast %cst_169 : f32 to vector<8x1xf32>
      %722 = arith.subf %721, %720 : vector<8x1xf32>
      %723 = arith.mulf %692, %693 : vector<8x1xf32>
      %724 = arith.mulf %691, %690 : vector<8x1xf32>
      %725 = arith.subf %723, %724 : vector<8x1xf32>
      %cst_170 = arith.constant 2.000000e+00 : f32
      %726 = vector.broadcast %cst_170 : f32 to vector<8x1xf32>
      %727 = arith.mulf %726, %725 : vector<8x1xf32>
      %728 = arith.mulf %691, %693 : vector<8x1xf32>
      %729 = arith.mulf %692, %690 : vector<8x1xf32>
      %730 = arith.subf %728, %729 : vector<8x1xf32>
      %cst_171 = arith.constant 2.000000e+00 : f32
      %731 = vector.broadcast %cst_171 : f32 to vector<8x1xf32>
      %732 = arith.mulf %731, %730 : vector<8x1xf32>
      %733 = arith.mulf %692, %693 : vector<8x1xf32>
      %734 = arith.mulf %691, %690 : vector<8x1xf32>
      %735 = arith.addf %733, %734 : vector<8x1xf32>
      %cst_172 = arith.constant 2.000000e+00 : f32
      %736 = vector.broadcast %cst_172 : f32 to vector<8x1xf32>
      %737 = arith.mulf %736, %735 : vector<8x1xf32>
      %738 = arith.mulf %691, %691 : vector<8x1xf32>
      %739 = arith.mulf %692, %692 : vector<8x1xf32>
      %740 = arith.addf %738, %739 : vector<8x1xf32>
      %cst_173 = arith.constant 2.000000e+00 : f32
      %741 = vector.broadcast %cst_173 : f32 to vector<8x1xf32>
      %742 = arith.mulf %741, %740 : vector<8x1xf32>
      %cst_174 = arith.constant 1.000000e+00 : f32
      %743 = vector.broadcast %cst_174 : f32 to vector<8x1xf32>
      %744 = arith.subf %743, %742 : vector<8x1xf32>
      %c0_175 = arith.constant 0 : index
      %c0_176 = arith.constant 0 : index
      %c0_177 = arith.constant 0 : index
      %745 = vector.load %arg5[%c0_175, %c0_176, %c0_177] : memref<1x8x24xf32, #tpu.memory_space<vmem>>, vector<1x8x8xf32>
      %746 = vector.shape_cast %745 : vector<1x8x8xf32> to vector<8x8xf32>
      %c0_178 = arith.constant 0 : index
      %c0_179 = arith.constant 0 : index
      %c8_180 = arith.constant 8 : index
      %747 = vector.load %arg5[%c0_178, %c0_179, %c8_180] : memref<1x8x24xf32, #tpu.memory_space<vmem>>, vector<1x8x8xf32>
      %748 = vector.shape_cast %747 : vector<1x8x8xf32> to vector<8x8xf32>
      %c0_181 = arith.constant 0 : index
      %c0_182 = arith.constant 0 : index
      %c16_183 = arith.constant 16 : index
      %749 = vector.load %arg5[%c0_181, %c0_182, %c16_183] : memref<1x8x24xf32, #tpu.memory_space<vmem>>, vector<1x8x8xf32>
      %750 = vector.shape_cast %749 : vector<1x8x8xf32> to vector<8x8xf32>
      %751 = arith.mulf %700, %655 : vector<8x1xf32>
      %752 = vector.broadcast %751 : vector<8x1xf32> to vector<8x8xf32>
      %753 = arith.mulf %752, %746 : vector<8x8xf32>
      %754 = vector.broadcast %635 : vector<8x1xf32> to vector<8x8xf32>
      %755 = arith.addf %754, %753 : vector<8x8xf32>
      %756 = arith.mulf %705, %665 : vector<8x1xf32>
      %757 = vector.broadcast %756 : vector<8x1xf32> to vector<8x8xf32>
      %758 = arith.mulf %757, %748 : vector<8x8xf32>
      %759 = arith.addf %755, %758 : vector<8x8xf32>
      %760 = arith.mulf %710, %675 : vector<8x1xf32>
      %761 = vector.broadcast %760 : vector<8x1xf32> to vector<8x8xf32>
      %762 = arith.mulf %761, %750 : vector<8x8xf32>
      %763 = arith.addf %759, %762 : vector<8x8xf32>
      %764 = arith.mulf %715, %655 : vector<8x1xf32>
      %765 = vector.broadcast %764 : vector<8x1xf32> to vector<8x8xf32>
      %766 = arith.mulf %765, %746 : vector<8x8xf32>
      %767 = vector.broadcast %640 : vector<8x1xf32> to vector<8x8xf32>
      %768 = arith.addf %767, %766 : vector<8x8xf32>
      %769 = arith.mulf %722, %665 : vector<8x1xf32>
      %770 = vector.broadcast %769 : vector<8x1xf32> to vector<8x8xf32>
      %771 = arith.mulf %770, %748 : vector<8x8xf32>
      %772 = arith.addf %768, %771 : vector<8x8xf32>
      %773 = arith.mulf %727, %675 : vector<8x1xf32>
      %774 = vector.broadcast %773 : vector<8x1xf32> to vector<8x8xf32>
      %775 = arith.mulf %774, %750 : vector<8x8xf32>
      %776 = arith.addf %772, %775 : vector<8x8xf32>
      %777 = arith.mulf %732, %655 : vector<8x1xf32>
      %778 = vector.broadcast %777 : vector<8x1xf32> to vector<8x8xf32>
      %779 = arith.mulf %778, %746 : vector<8x8xf32>
      %780 = vector.broadcast %645 : vector<8x1xf32> to vector<8x8xf32>
      %781 = arith.addf %780, %779 : vector<8x8xf32>
      %782 = arith.mulf %737, %665 : vector<8x1xf32>
      %783 = vector.broadcast %782 : vector<8x1xf32> to vector<8x8xf32>
      %784 = arith.mulf %783, %748 : vector<8x8xf32>
      %785 = arith.addf %781, %784 : vector<8x8xf32>
      %786 = arith.mulf %744, %675 : vector<8x1xf32>
      %787 = vector.broadcast %786 : vector<8x1xf32> to vector<8x8xf32>
      %788 = arith.mulf %787, %750 : vector<8x8xf32>
      %789 = arith.addf %785, %788 : vector<8x8xf32>
      %790 = tpu.concatenate %763, %776, %789 in 1 : vector<8x8xf32>, vector<8x8xf32>, vector<8x8xf32> -> vector<8x24xf32>
      %c0_184 = arith.constant 0 : index
      %c0_185 = arith.constant 0 : index
      %c0_186 = arith.constant 0 : index
      %791 = vector.load %arg9[%c0_184, %c0_185, %c0_186] : memref<1x8x24xf32, #tpu.memory_space<vmem>>, vector<1x8x24xf32>
      %792 = vector.shape_cast %791 : vector<1x8x24xf32> to vector<8x24xf32>
      %793 = vector.shape_cast %790 : vector<8x24xf32> to vector<1x8x24xf32>
      tpu.vector_store %arg9[%c0_184, %c0_185, %c0_186], %793 {strides = array<i32>} : memref<1x8x24xf32, #tpu.memory_space<vmem>>, vector<1x8x24xf32>,
      %cst_187 = arith.constant 0.000000e+00 : f32
      %794 = vector.broadcast %cst_187 : f32 to vector<8x8x32xf32>
      %c0_188 = arith.constant 0 : index
      %c0_189 = arith.constant 0 : index
      %c0_190 = arith.constant 0 : index
      %c0_191 = arith.constant 0 : index
      %795 = vector.load %arg8[%c0_188, %c0_189, %c0_190, %c0_191] : memref<1x8x8x32xf32, #tpu.memory_space<vmem>>, vector<1x8x8x32xf32>
      %796 = vector.shape_cast %795 : vector<1x8x8x32xf32> to vector<8x8x32xf32>
      %797 = vector.shape_cast %794 : vector<8x8x32xf32> to vector<1x8x8x32xf32>
      tpu.vector_store %arg8[%c0_188, %c0_189, %c0_190, %c0_191], %797 {strides = array<i32>} : memref<1x8x8x32xf32, #tpu.memory_space<vmem>>, vector<1x8x8x32xf32>,
    } else {
    }
    %c0 = arith.constant 0 : index
    %c0_2 = arith.constant 0 : index
    %c0_3 = arith.constant 0 : index
    %5 = vector.load %arg9[%c0, %c0_2, %c0_3] : memref<1x8x24xf32, #tpu.memory_space<vmem>>, vector<1x8x8xf32>
    %6 = vector.shape_cast %5 : vector<1x8x8xf32> to vector<8x8xf32>
    %c0_4 = arith.constant 0 : index
    %c0_5 = arith.constant 0 : index
    %c8 = arith.constant 8 : index
    %7 = vector.load %arg9[%c0_4, %c0_5, %c8] : memref<1x8x24xf32, #tpu.memory_space<vmem>>, vector<1x8x8xf32>
    %8 = vector.shape_cast %7 : vector<1x8x8xf32> to vector<8x8xf32>
    %c0_6 = arith.constant 0 : index
    %c0_7 = arith.constant 0 : index
    %c16 = arith.constant 16 : index
    %9 = vector.load %arg9[%c0_6, %c0_7, %c16] : memref<1x8x24xf32, #tpu.memory_space<vmem>>, vector<1x8x8xf32>
    %10 = vector.shape_cast %9 : vector<1x8x8xf32> to vector<8x8xf32>
    %c2_i32 = arith.constant 2 : i32
    %11 = arith.muli %arg0, %c2_i32 : i32
    %12 = arith.addi %11, %arg2 : i32
    %c16_i32 = arith.constant 16 : i32
    %13 = arith.muli %12, %c16_i32 : i32
    %c0_i32_8 = arith.constant 0 : i32
    %14 = arith.addi %13, %c0_i32_8 : i32
    %c0_i32_9 = arith.constant 0 : i32
    %15 = arith.addi %14, %c0_i32_9 : i32
    %16 = arith.index_cast %15 : i32 to index
    %17 = memref.load %arg6[%16] : memref<64xf32, #tpu.memory_space<smem>>
    %18 = vector.broadcast %17 : f32 to vector<8x8xf32>
    %19 = arith.mulf %18, %6 : vector<8x8xf32>
    %c0_i32_10 = arith.constant 0 : i32
    %20 = arith.addi %13, %c0_i32_10 : i32
    %c1_i32 = arith.constant 1 : i32
    %21 = arith.addi %20, %c1_i32 : i32
    %22 = arith.index_cast %21 : i32 to index
    %23 = memref.load %arg6[%22] : memref<64xf32, #tpu.memory_space<smem>>
    %24 = vector.broadcast %23 : f32 to vector<8x8xf32>
    %25 = arith.mulf %24, %8 : vector<8x8xf32>
    %26 = arith.addf %19, %25 : vector<8x8xf32>
    %c0_i32_11 = arith.constant 0 : i32
    %27 = arith.addi %13, %c0_i32_11 : i32
    %c2_i32_12 = arith.constant 2 : i32
    %28 = arith.addi %27, %c2_i32_12 : i32
    %29 = arith.index_cast %28 : i32 to index
    %30 = memref.load %arg6[%29] : memref<64xf32, #tpu.memory_space<smem>>
    %31 = vector.broadcast %30 : f32 to vector<8x8xf32>
    %32 = arith.mulf %31, %10 : vector<8x8xf32>
    %33 = arith.addf %26, %32 : vector<8x8xf32>
    %c0_i32_13 = arith.constant 0 : i32
    %34 = arith.addi %13, %c0_i32_13 : i32
    %c3_i32 = arith.constant 3 : i32
    %35 = arith.addi %34, %c3_i32 : i32
    %36 = arith.index_cast %35 : i32 to index
    %37 = memref.load %arg6[%36] : memref<64xf32, #tpu.memory_space<smem>>
    %38 = vector.broadcast %37 : f32 to vector<8x8xf32>
    %39 = arith.addf %33, %38 : vector<8x8xf32>
    %c4_i32 = arith.constant 4 : i32
    %40 = arith.addi %13, %c4_i32 : i32
    %c0_i32_14 = arith.constant 0 : i32
    %41 = arith.addi %40, %c0_i32_14 : i32
    %42 = arith.index_cast %41 : i32 to index
    %43 = memref.load %arg6[%42] : memref<64xf32, #tpu.memory_space<smem>>
    %44 = vector.broadcast %43 : f32 to vector<8x8xf32>
    %45 = arith.mulf %44, %6 : vector<8x8xf32>
    %c4_i32_15 = arith.constant 4 : i32
    %46 = arith.addi %13, %c4_i32_15 : i32
    %c1_i32_16 = arith.constant 1 : i32
    %47 = arith.addi %46, %c1_i32_16 : i32
    %48 = arith.index_cast %47 : i32 to index
    %49 = memref.load %arg6[%48] : memref<64xf32, #tpu.memory_space<smem>>
    %50 = vector.broadcast %49 : f32 to vector<8x8xf32>
    %51 = arith.mulf %50, %8 : vector<8x8xf32>
    %52 = arith.addf %45, %51 : vector<8x8xf32>
    %c4_i32_17 = arith.constant 4 : i32
    %53 = arith.addi %13, %c4_i32_17 : i32
    %c2_i32_18 = arith.constant 2 : i32
    %54 = arith.addi %53, %c2_i32_18 : i32
    %55 = arith.index_cast %54 : i32 to index
    %56 = memref.load %arg6[%55] : memref<64xf32, #tpu.memory_space<smem>>
    %57 = vector.broadcast %56 : f32 to vector<8x8xf32>
    %58 = arith.mulf %57, %10 : vector<8x8xf32>
    %59 = arith.addf %52, %58 : vector<8x8xf32>
    %c4_i32_19 = arith.constant 4 : i32
    %60 = arith.addi %13, %c4_i32_19 : i32
    %c3_i32_20 = arith.constant 3 : i32
    %61 = arith.addi %60, %c3_i32_20 : i32
    %62 = arith.index_cast %61 : i32 to index
    %63 = memref.load %arg6[%62] : memref<64xf32, #tpu.memory_space<smem>>
    %64 = vector.broadcast %63 : f32 to vector<8x8xf32>
    %65 = arith.addf %59, %64 : vector<8x8xf32>
    %c8_i32 = arith.constant 8 : i32
    %66 = arith.addi %13, %c8_i32 : i32
    %c0_i32_21 = arith.constant 0 : i32
    %67 = arith.addi %66, %c0_i32_21 : i32
    %68 = arith.index_cast %67 : i32 to index
    %69 = memref.load %arg6[%68] : memref<64xf32, #tpu.memory_space<smem>>
    %70 = vector.broadcast %69 : f32 to vector<8x8xf32>
    %71 = arith.mulf %70, %6 : vector<8x8xf32>
    %c8_i32_22 = arith.constant 8 : i32
    %72 = arith.addi %13, %c8_i32_22 : i32
    %c1_i32_23 = arith.constant 1 : i32
    %73 = arith.addi %72, %c1_i32_23 : i32
    %74 = arith.index_cast %73 : i32 to index
    %75 = memref.load %arg6[%74] : memref<64xf32, #tpu.memory_space<smem>>
    %76 = vector.broadcast %75 : f32 to vector<8x8xf32>
    %77 = arith.mulf %76, %8 : vector<8x8xf32>
    %78 = arith.addf %71, %77 : vector<8x8xf32>
    %c8_i32_24 = arith.constant 8 : i32
    %79 = arith.addi %13, %c8_i32_24 : i32
    %c2_i32_25 = arith.constant 2 : i32
    %80 = arith.addi %79, %c2_i32_25 : i32
    %81 = arith.index_cast %80 : i32 to index
    %82 = memref.load %arg6[%81] : memref<64xf32, #tpu.memory_space<smem>>
    %83 = vector.broadcast %82 : f32 to vector<8x8xf32>
    %84 = arith.mulf %83, %10 : vector<8x8xf32>
    %85 = arith.addf %78, %84 : vector<8x8xf32>
    %c8_i32_26 = arith.constant 8 : i32
    %86 = arith.addi %13, %c8_i32_26 : i32
    %c3_i32_27 = arith.constant 3 : i32
    %87 = arith.addi %86, %c3_i32_27 : i32
    %88 = arith.index_cast %87 : i32 to index
    %89 = memref.load %arg6[%88] : memref<64xf32, #tpu.memory_space<smem>>
    %90 = vector.broadcast %89 : f32 to vector<8x8xf32>
    %91 = arith.addf %85, %90 : vector<8x8xf32>
    %cst = arith.constant 9.99999974E-6 : f32
    %92 = vector.broadcast %cst : f32 to vector<8x8xf32>
    %93 = arith.maximumf %91, %92 : vector<8x8xf32>
    %cst_28 = arith.constant 1.600000e+01 : f32
    %94 = vector.broadcast %cst_28 : f32 to vector<8x8xf32>
    %95 = arith.mulf %93, %94 : vector<8x8xf32>
    %96 = arith.divf %39, %95 : vector<8x8xf32>
    %cst_29 = arith.constant 1.600000e+01 : f32
    %97 = vector.broadcast %cst_29 : f32 to vector<8x8xf32>
    %98 = arith.mulf %93, %97 : vector<8x8xf32>
    %99 = arith.divf %65, %98 : vector<8x8xf32>
    %cst_30 = arith.constant 9.99999974E-6 : f32
    %100 = vector.broadcast %cst_30 : f32 to vector<8x8xf32>
    %101 = arith.cmpf ogt, %91, %100 : vector<8x8xf32>
    %cst_31 = arith.constant 0.000000e+00 : f32
    %102 = vector.broadcast %cst_31 : f32 to vector<8x8xf32>
    %103 = arith.cmpf ogt, %96, %102 : vector<8x8xf32>
    %104 = arith.andi %101, %103 : vector<8x8xi1>
    %cst_32 = arith.constant 1.000000e+00 : f32
    %105 = vector.broadcast %cst_32 : f32 to vector<8x8xf32>
    %106 = arith.cmpf olt, %96, %105 : vector<8x8xf32>
    %107 = arith.andi %104, %106 : vector<8x8xi1>
    %cst_33 = arith.constant 0.000000e+00 : f32
    %108 = vector.broadcast %cst_33 : f32 to vector<8x8xf32>
    %109 = arith.cmpf ogt, %99, %108 : vector<8x8xf32>
    %110 = arith.andi %107, %109 : vector<8x8xi1>
    %cst_34 = arith.constant 1.000000e+00 : f32
    %111 = vector.broadcast %cst_34 : f32 to vector<8x8xf32>
    %112 = arith.cmpf olt, %99, %111 : vector<8x8xf32>
    %113 = arith.andi %110, %112 : vector<8x8xi1>
    %114 = arith.extui %113 : vector<8x8xi1> to vector<8x8xi32>
    %115 = arith.sitofp %114 : vector<8x8xi32> to vector<8x8xf32>
    %cst_35 = arith.constant 1.600000e+01 : f32
    %116 = vector.broadcast %cst_35 : f32 to vector<8x8xf32>
    %117 = arith.mulf %96, %116 : vector<8x8xf32>
    %cst_36 = arith.constant 5.000000e-01 : f32
    %118 = vector.broadcast %cst_36 : f32 to vector<8x8xf32>
    %119 = arith.subf %117, %118 : vector<8x8xf32>
    %cst_37 = arith.constant 1.600000e+01 : f32
    %120 = vector.broadcast %cst_37 : f32 to vector<8x8xf32>
    %121 = arith.mulf %99, %120 : vector<8x8xf32>
    %cst_38 = arith.constant 5.000000e-01 : f32
    %122 = vector.broadcast %cst_38 : f32 to vector<8x8xf32>
    %123 = arith.subf %121, %122 : vector<8x8xf32>
    %124 = math.floor %119 : vector<8x8xf32>
    %125 = math.floor %123 : vector<8x8xf32>
    %126 = arith.subf %119, %124 : vector<8x8xf32>
    %127 = arith.subf %123, %125 : vector<8x8xf32>
    %128 = arith.fptosi %124 : vector<8x8xf32> to vector<8x8xi32>
    %129 = arith.fptosi %125 : vector<8x8xf32> to vector<8x8xi32>
    %c1_i32_39 = arith.constant 1 : i32
    %130 = vector.broadcast %c1_i32_39 : i32 to vector<8x8xi32>
    %131 = arith.addi %128, %130 : vector<8x8xi32>
    %c1_i32_40 = arith.constant 1 : i32
    %132 = vector.broadcast %c1_i32_40 : i32 to vector<8x8xi32>
    %133 = arith.addi %129, %132 : vector<8x8xi32>
    %c0_i32_41 = arith.constant 0 : i32
    %134 = vector.broadcast %c0_i32_41 : i32 to vector<8x8xi32>
    %135 = arith.cmpi sge, %128, %134 : vector<8x8xi32>
    %136 = arith.extui %135 : vector<8x8xi1> to vector<8x8xi32>
    %137 = arith.sitofp %136 : vector<8x8xi32> to vector<8x8xf32>
    %c16_i32_42 = arith.constant 16 : i32
    %138 = vector.broadcast %c16_i32_42 : i32 to vector<8x8xi32>
    %139 = arith.cmpi slt, %131, %138 : vector<8x8xi32>
    %140 = arith.extui %139 : vector<8x8xi1> to vector<8x8xi32>
    %141 = arith.sitofp %140 : vector<8x8xi32> to vector<8x8xf32>
    %c0_i32_43 = arith.constant 0 : i32
    %142 = vector.broadcast %c0_i32_43 : i32 to vector<8x8xi32>
    %143 = arith.cmpi sge, %129, %142 : vector<8x8xi32>
    %144 = arith.extui %143 : vector<8x8xi1> to vector<8x8xi32>
    %145 = arith.sitofp %144 : vector<8x8xi32> to vector<8x8xf32>
    %c16_i32_44 = arith.constant 16 : i32
    %146 = vector.broadcast %c16_i32_44 : i32 to vector<8x8xi32>
    %147 = arith.cmpi slt, %133, %146 : vector<8x8xi32>
    %148 = arith.extui %147 : vector<8x8xi1> to vector<8x8xi32>
    %149 = arith.sitofp %148 : vector<8x8xi32> to vector<8x8xf32>
    %cst_45 = arith.constant 1.000000e+00 : f32
    %150 = vector.broadcast %cst_45 : f32 to vector<8x8xf32>
    %151 = arith.subf %150, %126 : vector<8x8xf32>
    %cst_46 = arith.constant 1.000000e+00 : f32
    %152 = vector.broadcast %cst_46 : f32 to vector<8x8xf32>
    %153 = arith.subf %152, %127 : vector<8x8xf32>
    %154 = arith.mulf %151, %153 : vector<8x8xf32>
    %155 = arith.mulf %154, %115 : vector<8x8xf32>
    %156 = arith.mulf %155, %137 : vector<8x8xf32>
    %157 = arith.mulf %156, %145 : vector<8x8xf32>
    %158 = arith.truncf %157 : vector<8x8xf32> to vector<8x8xbf16>
    %cst_47 = arith.constant 1.000000e+00 : f32
    %159 = vector.broadcast %cst_47 : f32 to vector<8x8xf32>
    %160 = arith.subf %159, %127 : vector<8x8xf32>
    %161 = arith.mulf %126, %160 : vector<8x8xf32>
    %162 = arith.mulf %161, %115 : vector<8x8xf32>
    %163 = arith.mulf %162, %141 : vector<8x8xf32>
    %164 = arith.mulf %163, %145 : vector<8x8xf32>
    %165 = arith.truncf %164 : vector<8x8xf32> to vector<8x8xbf16>
    %cst_48 = arith.constant 1.000000e+00 : f32
    %166 = vector.broadcast %cst_48 : f32 to vector<8x8xf32>
    %167 = arith.subf %166, %126 : vector<8x8xf32>
    %168 = arith.mulf %167, %127 : vector<8x8xf32>
    %169 = arith.mulf %168, %115 : vector<8x8xf32>
    %170 = arith.mulf %169, %137 : vector<8x8xf32>
    %171 = arith.mulf %170, %149 : vector<8x8xf32>
    %172 = arith.truncf %171 : vector<8x8xf32> to vector<8x8xbf16>
    %173 = arith.mulf %126, %127 : vector<8x8xf32>
    %174 = arith.mulf %173, %115 : vector<8x8xf32>
    %175 = arith.mulf %174, %141 : vector<8x8xf32>
    %176 = arith.mulf %175, %149 : vector<8x8xf32>
    %177 = arith.truncf %176 : vector<8x8xf32> to vector<8x8xbf16>
    %c16_i32_49 = arith.constant 16 : i32
    %178 = vector.broadcast %c16_i32_49 : i32 to vector<8x8xi32>
    %179 = arith.muli %129, %178 : vector<8x8xi32>
    %180 = arith.addi %179, %128 : vector<8x8xi32>
    %c128_i32 = arith.constant 128 : i32
    %181 = arith.muli %arg3, %c128_i32 : i32
    %182 = tpu.iota {dimensions = array<i32: 1>} : vector<1x128xi32>
    %183 = vector.broadcast %181 : i32 to vector<1x128xi32>
    %184 = arith.addi %182, %183 : vector<1x128xi32>
    %185 = vector.extract_strided_slice %180 {offsets = [0, 0], sizes = [8, 1], strides = [1, 1]} : vector<8x8xi32> to vector<8x1xi32>
    %186 = vector.extract_strided_slice %158 {offsets = [0, 0], sizes = [8, 1], strides = [1, 1]} : vector<8x8xbf16> to vector<8x1xbf16>
    %187 = vector.broadcast %184 : vector<1x128xi32> to vector<8x128xi32>
    %188 = vector.broadcast %185 : vector<8x1xi32> to vector<8x128xi32>
    %189 = arith.cmpi eq, %187, %188 : vector<8x128xi32>
    %190 = arith.extui %189 : vector<8x128xi1> to vector<8x128xi32>
    %191 = arith.sitofp %190 : vector<8x128xi32> to vector<8x128xf32>
    %192 = arith.truncf %191 : vector<8x128xf32> to vector<8x128xbf16>
    %193 = vector.broadcast %186 : vector<8x1xbf16> to vector<8x128xbf16>
    %194 = arith.mulf %193, %192 : vector<8x128xbf16>
    %195 = vector.extract_strided_slice %165 {offsets = [0, 0], sizes = [8, 1], strides = [1, 1]} : vector<8x8xbf16> to vector<8x1xbf16>
    %c1_i32_50 = arith.constant 1 : i32
    %196 = vector.broadcast %c1_i32_50 : i32 to vector<8x1xi32>
    %197 = arith.addi %185, %196 : vector<8x1xi32>
    %198 = vector.broadcast %184 : vector<1x128xi32> to vector<8x128xi32>
    %199 = vector.broadcast %197 : vector<8x1xi32> to vector<8x128xi32>
    %200 = arith.cmpi eq, %198, %199 : vector<8x128xi32>
    %201 = arith.extui %200 : vector<8x128xi1> to vector<8x128xi32>
    %202 = arith.sitofp %201 : vector<8x128xi32> to vector<8x128xf32>
    %203 = arith.truncf %202 : vector<8x128xf32> to vector<8x128xbf16>
    %204 = vector.broadcast %195 : vector<8x1xbf16> to vector<8x128xbf16>
    %205 = arith.mulf %204, %203 : vector<8x128xbf16>
    %206 = arith.addf %194, %205 : vector<8x128xbf16>
    %207 = vector.extract_strided_slice %172 {offsets = [0, 0], sizes = [8, 1], strides = [1, 1]} : vector<8x8xbf16> to vector<8x1xbf16>
    %c16_i32_51 = arith.constant 16 : i32
    %208 = vector.broadcast %c16_i32_51 : i32 to vector<8x1xi32>
    %209 = arith.addi %185, %208 : vector<8x1xi32>
    %210 = vector.broadcast %184 : vector<1x128xi32> to vector<8x128xi32>
    %211 = vector.broadcast %209 : vector<8x1xi32> to vector<8x128xi32>
    %212 = arith.cmpi eq, %210, %211 : vector<8x128xi32>
    %213 = arith.extui %212 : vector<8x128xi1> to vector<8x128xi32>
    %214 = arith.sitofp %213 : vector<8x128xi32> to vector<8x128xf32>
    %215 = arith.truncf %214 : vector<8x128xf32> to vector<8x128xbf16>
    %216 = vector.broadcast %207 : vector<8x1xbf16> to vector<8x128xbf16>
    %217 = arith.mulf %216, %215 : vector<8x128xbf16>
    %218 = arith.addf %206, %217 : vector<8x128xbf16>
    %219 = vector.extract_strided_slice %177 {offsets = [0, 0], sizes = [8, 1], strides = [1, 1]} : vector<8x8xbf16> to vector<8x1xbf16>
    %c16_i32_52 = arith.constant 16 : i32
    %220 = vector.broadcast %c16_i32_52 : i32 to vector<8x1xi32>
    %221 = arith.addi %185, %220 : vector<8x1xi32>
    %c1_i32_53 = arith.constant 1 : i32
    %222 = vector.broadcast %c1_i32_53 : i32 to vector<8x1xi32>
    %223 = arith.addi %221, %222 : vector<8x1xi32>
    %224 = vector.broadcast %184 : vector<1x128xi32> to vector<8x128xi32>
    %225 = vector.broadcast %223 : vector<8x1xi32> to vector<8x128xi32>
    %226 = arith.cmpi eq, %224, %225 : vector<8x128xi32>
    %227 = arith.extui %226 : vector<8x128xi1> to vector<8x128xi32>
    %228 = arith.sitofp %227 : vector<8x128xi32> to vector<8x128xf32>
    %229 = arith.truncf %228 : vector<8x128xf32> to vector<8x128xbf16>
    %230 = vector.broadcast %219 : vector<8x1xbf16> to vector<8x128xbf16>
    %231 = arith.mulf %230, %229 : vector<8x128xbf16>
    %232 = arith.addf %218, %231 : vector<8x128xbf16>
    %233 = vector.extract_strided_slice %180 {offsets = [0, 1], sizes = [8, 1], strides = [1, 1]} : vector<8x8xi32> to vector<8x1xi32>
    %234 = vector.extract_strided_slice %158 {offsets = [0, 1], sizes = [8, 1], strides = [1, 1]} : vector<8x8xbf16> to vector<8x1xbf16>
    %235 = vector.broadcast %184 : vector<1x128xi32> to vector<8x128xi32>
    %236 = vector.broadcast %233 : vector<8x1xi32> to vector<8x128xi32>
    %237 = arith.cmpi eq, %235, %236 : vector<8x128xi32>
    %238 = arith.extui %237 : vector<8x128xi1> to vector<8x128xi32>
    %239 = arith.sitofp %238 : vector<8x128xi32> to vector<8x128xf32>
    %240 = arith.truncf %239 : vector<8x128xf32> to vector<8x128xbf16>
    %241 = vector.broadcast %234 : vector<8x1xbf16> to vector<8x128xbf16>
    %242 = arith.mulf %241, %240 : vector<8x128xbf16>
    %243 = vector.extract_strided_slice %165 {offsets = [0, 1], sizes = [8, 1], strides = [1, 1]} : vector<8x8xbf16> to vector<8x1xbf16>
    %c1_i32_54 = arith.constant 1 : i32
    %244 = vector.broadcast %c1_i32_54 : i32 to vector<8x1xi32>
    %245 = arith.addi %233, %244 : vector<8x1xi32>
    %246 = vector.broadcast %184 : vector<1x128xi32> to vector<8x128xi32>
    %247 = vector.broadcast %245 : vector<8x1xi32> to vector<8x128xi32>
    %248 = arith.cmpi eq, %246, %247 : vector<8x128xi32>
    %249 = arith.extui %248 : vector<8x128xi1> to vector<8x128xi32>
    %250 = arith.sitofp %249 : vector<8x128xi32> to vector<8x128xf32>
    %251 = arith.truncf %250 : vector<8x128xf32> to vector<8x128xbf16>
    %252 = vector.broadcast %243 : vector<8x1xbf16> to vector<8x128xbf16>
    %253 = arith.mulf %252, %251 : vector<8x128xbf16>
    %254 = arith.addf %242, %253 : vector<8x128xbf16>
    %255 = vector.extract_strided_slice %172 {offsets = [0, 1], sizes = [8, 1], strides = [1, 1]} : vector<8x8xbf16> to vector<8x1xbf16>
    %c16_i32_55 = arith.constant 16 : i32
    %256 = vector.broadcast %c16_i32_55 : i32 to vector<8x1xi32>
    %257 = arith.addi %233, %256 : vector<8x1xi32>
    %258 = vector.broadcast %184 : vector<1x128xi32> to vector<8x128xi32>
    %259 = vector.broadcast %257 : vector<8x1xi32> to vector<8x128xi32>
    %260 = arith.cmpi eq, %258, %259 : vector<8x128xi32>
    %261 = arith.extui %260 : vector<8x128xi1> to vector<8x128xi32>
    %262 = arith.sitofp %261 : vector<8x128xi32> to vector<8x128xf32>
    %263 = arith.truncf %262 : vector<8x128xf32> to vector<8x128xbf16>
    %264 = vector.broadcast %255 : vector<8x1xbf16> to vector<8x128xbf16>
    %265 = arith.mulf %264, %263 : vector<8x128xbf16>
    %266 = arith.addf %254, %265 : vector<8x128xbf16>
    %267 = vector.extract_strided_slice %177 {offsets = [0, 1], sizes = [8, 1], strides = [1, 1]} : vector<8x8xbf16> to vector<8x1xbf16>
    %c16_i32_56 = arith.constant 16 : i32
    %268 = vector.broadcast %c16_i32_56 : i32 to vector<8x1xi32>
    %269 = arith.addi %233, %268 : vector<8x1xi32>
    %c1_i32_57 = arith.constant 1 : i32
    %270 = vector.broadcast %c1_i32_57 : i32 to vector<8x1xi32>
    %271 = arith.addi %269, %270 : vector<8x1xi32>
    %272 = vector.broadcast %184 : vector<1x128xi32> to vector<8x128xi32>
    %273 = vector.broadcast %271 : vector<8x1xi32> to vector<8x128xi32>
    %274 = arith.cmpi eq, %272, %273 : vector<8x128xi32>
    %275 = arith.extui %274 : vector<8x128xi1> to vector<8x128xi32>
    %276 = arith.sitofp %275 : vector<8x128xi32> to vector<8x128xf32>
    %277 = arith.truncf %276 : vector<8x128xf32> to vector<8x128xbf16>
    %278 = vector.broadcast %267 : vector<8x1xbf16> to vector<8x128xbf16>
    %279 = arith.mulf %278, %277 : vector<8x128xbf16>
    %280 = arith.addf %266, %279 : vector<8x128xbf16>
    %281 = vector.extract_strided_slice %180 {offsets = [0, 2], sizes = [8, 1], strides = [1, 1]} : vector<8x8xi32> to vector<8x1xi32>
    %282 = vector.extract_strided_slice %158 {offsets = [0, 2], sizes = [8, 1], strides = [1, 1]} : vector<8x8xbf16> to vector<8x1xbf16>
    %283 = vector.broadcast %184 : vector<1x128xi32> to vector<8x128xi32>
    %284 = vector.broadcast %281 : vector<8x1xi32> to vector<8x128xi32>
    %285 = arith.cmpi eq, %283, %284 : vector<8x128xi32>
    %286 = arith.extui %285 : vector<8x128xi1> to vector<8x128xi32>
    %287 = arith.sitofp %286 : vector<8x128xi32> to vector<8x128xf32>
    %288 = arith.truncf %287 : vector<8x128xf32> to vector<8x128xbf16>
    %289 = vector.broadcast %282 : vector<8x1xbf16> to vector<8x128xbf16>
    %290 = arith.mulf %289, %288 : vector<8x128xbf16>
    %291 = vector.extract_strided_slice %165 {offsets = [0, 2], sizes = [8, 1], strides = [1, 1]} : vector<8x8xbf16> to vector<8x1xbf16>
    %c1_i32_58 = arith.constant 1 : i32
    %292 = vector.broadcast %c1_i32_58 : i32 to vector<8x1xi32>
    %293 = arith.addi %281, %292 : vector<8x1xi32>
    %294 = vector.broadcast %184 : vector<1x128xi32> to vector<8x128xi32>
    %295 = vector.broadcast %293 : vector<8x1xi32> to vector<8x128xi32>
    %296 = arith.cmpi eq, %294, %295 : vector<8x128xi32>
    %297 = arith.extui %296 : vector<8x128xi1> to vector<8x128xi32>
    %298 = arith.sitofp %297 : vector<8x128xi32> to vector<8x128xf32>
    %299 = arith.truncf %298 : vector<8x128xf32> to vector<8x128xbf16>
    %300 = vector.broadcast %291 : vector<8x1xbf16> to vector<8x128xbf16>
    %301 = arith.mulf %300, %299 : vector<8x128xbf16>
    %302 = arith.addf %290, %301 : vector<8x128xbf16>
    %303 = vector.extract_strided_slice %172 {offsets = [0, 2], sizes = [8, 1], strides = [1, 1]} : vector<8x8xbf16> to vector<8x1xbf16>
    %c16_i32_59 = arith.constant 16 : i32
    %304 = vector.broadcast %c16_i32_59 : i32 to vector<8x1xi32>
    %305 = arith.addi %281, %304 : vector<8x1xi32>
    %306 = vector.broadcast %184 : vector<1x128xi32> to vector<8x128xi32>
    %307 = vector.broadcast %305 : vector<8x1xi32> to vector<8x128xi32>
    %308 = arith.cmpi eq, %306, %307 : vector<8x128xi32>
    %309 = arith.extui %308 : vector<8x128xi1> to vector<8x128xi32>
    %310 = arith.sitofp %309 : vector<8x128xi32> to vector<8x128xf32>
    %311 = arith.truncf %310 : vector<8x128xf32> to vector<8x128xbf16>
    %312 = vector.broadcast %303 : vector<8x1xbf16> to vector<8x128xbf16>
    %313 = arith.mulf %312, %311 : vector<8x128xbf16>
    %314 = arith.addf %302, %313 : vector<8x128xbf16>
    %315 = vector.extract_strided_slice %177 {offsets = [0, 2], sizes = [8, 1], strides = [1, 1]} : vector<8x8xbf16> to vector<8x1xbf16>
    %c16_i32_60 = arith.constant 16 : i32
    %316 = vector.broadcast %c16_i32_60 : i32 to vector<8x1xi32>
    %317 = arith.addi %281, %316 : vector<8x1xi32>
    %c1_i32_61 = arith.constant 1 : i32
    %318 = vector.broadcast %c1_i32_61 : i32 to vector<8x1xi32>
    %319 = arith.addi %317, %318 : vector<8x1xi32>
    %320 = vector.broadcast %184 : vector<1x128xi32> to vector<8x128xi32>
    %321 = vector.broadcast %319 : vector<8x1xi32> to vector<8x128xi32>
    %322 = arith.cmpi eq, %320, %321 : vector<8x128xi32>
    %323 = arith.extui %322 : vector<8x128xi1> to vector<8x128xi32>
    %324 = arith.sitofp %323 : vector<8x128xi32> to vector<8x128xf32>
    %325 = arith.truncf %324 : vector<8x128xf32> to vector<8x128xbf16>
    %326 = vector.broadcast %315 : vector<8x1xbf16> to vector<8x128xbf16>
    %327 = arith.mulf %326, %325 : vector<8x128xbf16>
    %328 = arith.addf %314, %327 : vector<8x128xbf16>
    %329 = vector.extract_strided_slice %180 {offsets = [0, 3], sizes = [8, 1], strides = [1, 1]} : vector<8x8xi32> to vector<8x1xi32>
    %330 = vector.extract_strided_slice %158 {offsets = [0, 3], sizes = [8, 1], strides = [1, 1]} : vector<8x8xbf16> to vector<8x1xbf16>
    %331 = vector.broadcast %184 : vector<1x128xi32> to vector<8x128xi32>
    %332 = vector.broadcast %329 : vector<8x1xi32> to vector<8x128xi32>
    %333 = arith.cmpi eq, %331, %332 : vector<8x128xi32>
    %334 = arith.extui %333 : vector<8x128xi1> to vector<8x128xi32>
    %335 = arith.sitofp %334 : vector<8x128xi32> to vector<8x128xf32>
    %336 = arith.truncf %335 : vector<8x128xf32> to vector<8x128xbf16>
    %337 = vector.broadcast %330 : vector<8x1xbf16> to vector<8x128xbf16>
    %338 = arith.mulf %337, %336 : vector<8x128xbf16>
    %339 = vector.extract_strided_slice %165 {offsets = [0, 3], sizes = [8, 1], strides = [1, 1]} : vector<8x8xbf16> to vector<8x1xbf16>
    %c1_i32_62 = arith.constant 1 : i32
    %340 = vector.broadcast %c1_i32_62 : i32 to vector<8x1xi32>
    %341 = arith.addi %329, %340 : vector<8x1xi32>
    %342 = vector.broadcast %184 : vector<1x128xi32> to vector<8x128xi32>
    %343 = vector.broadcast %341 : vector<8x1xi32> to vector<8x128xi32>
    %344 = arith.cmpi eq, %342, %343 : vector<8x128xi32>
    %345 = arith.extui %344 : vector<8x128xi1> to vector<8x128xi32>
    %346 = arith.sitofp %345 : vector<8x128xi32> to vector<8x128xf32>
    %347 = arith.truncf %346 : vector<8x128xf32> to vector<8x128xbf16>
    %348 = vector.broadcast %339 : vector<8x1xbf16> to vector<8x128xbf16>
    %349 = arith.mulf %348, %347 : vector<8x128xbf16>
    %350 = arith.addf %338, %349 : vector<8x128xbf16>
    %351 = vector.extract_strided_slice %172 {offsets = [0, 3], sizes = [8, 1], strides = [1, 1]} : vector<8x8xbf16> to vector<8x1xbf16>
    %c16_i32_63 = arith.constant 16 : i32
    %352 = vector.broadcast %c16_i32_63 : i32 to vector<8x1xi32>
    %353 = arith.addi %329, %352 : vector<8x1xi32>
    %354 = vector.broadcast %184 : vector<1x128xi32> to vector<8x128xi32>
    %355 = vector.broadcast %353 : vector<8x1xi32> to vector<8x128xi32>
    %356 = arith.cmpi eq, %354, %355 : vector<8x128xi32>
    %357 = arith.extui %356 : vector<8x128xi1> to vector<8x128xi32>
    %358 = arith.sitofp %357 : vector<8x128xi32> to vector<8x128xf32>
    %359 = arith.truncf %358 : vector<8x128xf32> to vector<8x128xbf16>
    %360 = vector.broadcast %351 : vector<8x1xbf16> to vector<8x128xbf16>
    %361 = arith.mulf %360, %359 : vector<8x128xbf16>
    %362 = arith.addf %350, %361 : vector<8x128xbf16>
    %363 = vector.extract_strided_slice %177 {offsets = [0, 3], sizes = [8, 1], strides = [1, 1]} : vector<8x8xbf16> to vector<8x1xbf16>
    %c16_i32_64 = arith.constant 16 : i32
    %364 = vector.broadcast %c16_i32_64 : i32 to vector<8x1xi32>
    %365 = arith.addi %329, %364 : vector<8x1xi32>
    %c1_i32_65 = arith.constant 1 : i32
    %366 = vector.broadcast %c1_i32_65 : i32 to vector<8x1xi32>
    %367 = arith.addi %365, %366 : vector<8x1xi32>
    %368 = vector.broadcast %184 : vector<1x128xi32> to vector<8x128xi32>
    %369 = vector.broadcast %367 : vector<8x1xi32> to vector<8x128xi32>
    %370 = arith.cmpi eq, %368, %369 : vector<8x128xi32>
    %371 = arith.extui %370 : vector<8x128xi1> to vector<8x128xi32>
    %372 = arith.sitofp %371 : vector<8x128xi32> to vector<8x128xf32>
    %373 = arith.truncf %372 : vector<8x128xf32> to vector<8x128xbf16>
    %374 = vector.broadcast %363 : vector<8x1xbf16> to vector<8x128xbf16>
    %375 = arith.mulf %374, %373 : vector<8x128xbf16>
    %376 = arith.addf %362, %375 : vector<8x128xbf16>
    %377 = vector.extract_strided_slice %180 {offsets = [0, 4], sizes = [8, 1], strides = [1, 1]} : vector<8x8xi32> to vector<8x1xi32>
    %378 = vector.extract_strided_slice %158 {offsets = [0, 4], sizes = [8, 1], strides = [1, 1]} : vector<8x8xbf16> to vector<8x1xbf16>
    %379 = vector.broadcast %184 : vector<1x128xi32> to vector<8x128xi32>
    %380 = vector.broadcast %377 : vector<8x1xi32> to vector<8x128xi32>
    %381 = arith.cmpi eq, %379, %380 : vector<8x128xi32>
    %382 = arith.extui %381 : vector<8x128xi1> to vector<8x128xi32>
    %383 = arith.sitofp %382 : vector<8x128xi32> to vector<8x128xf32>
    %384 = arith.truncf %383 : vector<8x128xf32> to vector<8x128xbf16>
    %385 = vector.broadcast %378 : vector<8x1xbf16> to vector<8x128xbf16>
    %386 = arith.mulf %385, %384 : vector<8x128xbf16>
    %387 = vector.extract_strided_slice %165 {offsets = [0, 4], sizes = [8, 1], strides = [1, 1]} : vector<8x8xbf16> to vector<8x1xbf16>
    %c1_i32_66 = arith.constant 1 : i32
    %388 = vector.broadcast %c1_i32_66 : i32 to vector<8x1xi32>
    %389 = arith.addi %377, %388 : vector<8x1xi32>
    %390 = vector.broadcast %184 : vector<1x128xi32> to vector<8x128xi32>
    %391 = vector.broadcast %389 : vector<8x1xi32> to vector<8x128xi32>
    %392 = arith.cmpi eq, %390, %391 : vector<8x128xi32>
    %393 = arith.extui %392 : vector<8x128xi1> to vector<8x128xi32>
    %394 = arith.sitofp %393 : vector<8x128xi32> to vector<8x128xf32>
    %395 = arith.truncf %394 : vector<8x128xf32> to vector<8x128xbf16>
    %396 = vector.broadcast %387 : vector<8x1xbf16> to vector<8x128xbf16>
    %397 = arith.mulf %396, %395 : vector<8x128xbf16>
    %398 = arith.addf %386, %397 : vector<8x128xbf16>
    %399 = vector.extract_strided_slice %172 {offsets = [0, 4], sizes = [8, 1], strides = [1, 1]} : vector<8x8xbf16> to vector<8x1xbf16>
    %c16_i32_67 = arith.constant 16 : i32
    %400 = vector.broadcast %c16_i32_67 : i32 to vector<8x1xi32>
    %401 = arith.addi %377, %400 : vector<8x1xi32>
    %402 = vector.broadcast %184 : vector<1x128xi32> to vector<8x128xi32>
    %403 = vector.broadcast %401 : vector<8x1xi32> to vector<8x128xi32>
    %404 = arith.cmpi eq, %402, %403 : vector<8x128xi32>
    %405 = arith.extui %404 : vector<8x128xi1> to vector<8x128xi32>
    %406 = arith.sitofp %405 : vector<8x128xi32> to vector<8x128xf32>
    %407 = arith.truncf %406 : vector<8x128xf32> to vector<8x128xbf16>
    %408 = vector.broadcast %399 : vector<8x1xbf16> to vector<8x128xbf16>
    %409 = arith.mulf %408, %407 : vector<8x128xbf16>
    %410 = arith.addf %398, %409 : vector<8x128xbf16>
    %411 = vector.extract_strided_slice %177 {offsets = [0, 4], sizes = [8, 1], strides = [1, 1]} : vector<8x8xbf16> to vector<8x1xbf16>
    %c16_i32_68 = arith.constant 16 : i32
    %412 = vector.broadcast %c16_i32_68 : i32 to vector<8x1xi32>
    %413 = arith.addi %377, %412 : vector<8x1xi32>
    %c1_i32_69 = arith.constant 1 : i32
    %414 = vector.broadcast %c1_i32_69 : i32 to vector<8x1xi32>
    %415 = arith.addi %413, %414 : vector<8x1xi32>
    %416 = vector.broadcast %184 : vector<1x128xi32> to vector<8x128xi32>
    %417 = vector.broadcast %415 : vector<8x1xi32> to vector<8x128xi32>
    %418 = arith.cmpi eq, %416, %417 : vector<8x128xi32>
    %419 = arith.extui %418 : vector<8x128xi1> to vector<8x128xi32>
    %420 = arith.sitofp %419 : vector<8x128xi32> to vector<8x128xf32>
    %421 = arith.truncf %420 : vector<8x128xf32> to vector<8x128xbf16>
    %422 = vector.broadcast %411 : vector<8x1xbf16> to vector<8x128xbf16>
    %423 = arith.mulf %422, %421 : vector<8x128xbf16>
    %424 = arith.addf %410, %423 : vector<8x128xbf16>
    %425 = vector.extract_strided_slice %180 {offsets = [0, 5], sizes = [8, 1], strides = [1, 1]} : vector<8x8xi32> to vector<8x1xi32>
    %426 = vector.extract_strided_slice %158 {offsets = [0, 5], sizes = [8, 1], strides = [1, 1]} : vector<8x8xbf16> to vector<8x1xbf16>
    %427 = vector.broadcast %184 : vector<1x128xi32> to vector<8x128xi32>
    %428 = vector.broadcast %425 : vector<8x1xi32> to vector<8x128xi32>
    %429 = arith.cmpi eq, %427, %428 : vector<8x128xi32>
    %430 = arith.extui %429 : vector<8x128xi1> to vector<8x128xi32>
    %431 = arith.sitofp %430 : vector<8x128xi32> to vector<8x128xf32>
    %432 = arith.truncf %431 : vector<8x128xf32> to vector<8x128xbf16>
    %433 = vector.broadcast %426 : vector<8x1xbf16> to vector<8x128xbf16>
    %434 = arith.mulf %433, %432 : vector<8x128xbf16>
    %435 = vector.extract_strided_slice %165 {offsets = [0, 5], sizes = [8, 1], strides = [1, 1]} : vector<8x8xbf16> to vector<8x1xbf16>
    %c1_i32_70 = arith.constant 1 : i32
    %436 = vector.broadcast %c1_i32_70 : i32 to vector<8x1xi32>
    %437 = arith.addi %425, %436 : vector<8x1xi32>
    %438 = vector.broadcast %184 : vector<1x128xi32> to vector<8x128xi32>
    %439 = vector.broadcast %437 : vector<8x1xi32> to vector<8x128xi32>
    %440 = arith.cmpi eq, %438, %439 : vector<8x128xi32>
    %441 = arith.extui %440 : vector<8x128xi1> to vector<8x128xi32>
    %442 = arith.sitofp %441 : vector<8x128xi32> to vector<8x128xf32>
    %443 = arith.truncf %442 : vector<8x128xf32> to vector<8x128xbf16>
    %444 = vector.broadcast %435 : vector<8x1xbf16> to vector<8x128xbf16>
    %445 = arith.mulf %444, %443 : vector<8x128xbf16>
    %446 = arith.addf %434, %445 : vector<8x128xbf16>
    %447 = vector.extract_strided_slice %172 {offsets = [0, 5], sizes = [8, 1], strides = [1, 1]} : vector<8x8xbf16> to vector<8x1xbf16>
    %c16_i32_71 = arith.constant 16 : i32
    %448 = vector.broadcast %c16_i32_71 : i32 to vector<8x1xi32>
    %449 = arith.addi %425, %448 : vector<8x1xi32>
    %450 = vector.broadcast %184 : vector<1x128xi32> to vector<8x128xi32>
    %451 = vector.broadcast %449 : vector<8x1xi32> to vector<8x128xi32>
    %452 = arith.cmpi eq, %450, %451 : vector<8x128xi32>
    %453 = arith.extui %452 : vector<8x128xi1> to vector<8x128xi32>
    %454 = arith.sitofp %453 : vector<8x128xi32> to vector<8x128xf32>
    %455 = arith.truncf %454 : vector<8x128xf32> to vector<8x128xbf16>
    %456 = vector.broadcast %447 : vector<8x1xbf16> to vector<8x128xbf16>
    %457 = arith.mulf %456, %455 : vector<8x128xbf16>
    %458 = arith.addf %446, %457 : vector<8x128xbf16>
    %459 = vector.extract_strided_slice %177 {offsets = [0, 5], sizes = [8, 1], strides = [1, 1]} : vector<8x8xbf16> to vector<8x1xbf16>
    %c16_i32_72 = arith.constant 16 : i32
    %460 = vector.broadcast %c16_i32_72 : i32 to vector<8x1xi32>
    %461 = arith.addi %425, %460 : vector<8x1xi32>
    %c1_i32_73 = arith.constant 1 : i32
    %462 = vector.broadcast %c1_i32_73 : i32 to vector<8x1xi32>
    %463 = arith.addi %461, %462 : vector<8x1xi32>
    %464 = vector.broadcast %184 : vector<1x128xi32> to vector<8x128xi32>
    %465 = vector.broadcast %463 : vector<8x1xi32> to vector<8x128xi32>
    %466 = arith.cmpi eq, %464, %465 : vector<8x128xi32>
    %467 = arith.extui %466 : vector<8x128xi1> to vector<8x128xi32>
    %468 = arith.sitofp %467 : vector<8x128xi32> to vector<8x128xf32>
    %469 = arith.truncf %468 : vector<8x128xf32> to vector<8x128xbf16>
    %470 = vector.broadcast %459 : vector<8x1xbf16> to vector<8x128xbf16>
    %471 = arith.mulf %470, %469 : vector<8x128xbf16>
    %472 = arith.addf %458, %471 : vector<8x128xbf16>
    %473 = vector.extract_strided_slice %180 {offsets = [0, 6], sizes = [8, 1], strides = [1, 1]} : vector<8x8xi32> to vector<8x1xi32>
    %474 = vector.extract_strided_slice %158 {offsets = [0, 6], sizes = [8, 1], strides = [1, 1]} : vector<8x8xbf16> to vector<8x1xbf16>
    %475 = vector.broadcast %184 : vector<1x128xi32> to vector<8x128xi32>
    %476 = vector.broadcast %473 : vector<8x1xi32> to vector<8x128xi32>
    %477 = arith.cmpi eq, %475, %476 : vector<8x128xi32>
    %478 = arith.extui %477 : vector<8x128xi1> to vector<8x128xi32>
    %479 = arith.sitofp %478 : vector<8x128xi32> to vector<8x128xf32>
    %480 = arith.truncf %479 : vector<8x128xf32> to vector<8x128xbf16>
    %481 = vector.broadcast %474 : vector<8x1xbf16> to vector<8x128xbf16>
    %482 = arith.mulf %481, %480 : vector<8x128xbf16>
    %483 = vector.extract_strided_slice %165 {offsets = [0, 6], sizes = [8, 1], strides = [1, 1]} : vector<8x8xbf16> to vector<8x1xbf16>
    %c1_i32_74 = arith.constant 1 : i32
    %484 = vector.broadcast %c1_i32_74 : i32 to vector<8x1xi32>
    %485 = arith.addi %473, %484 : vector<8x1xi32>
    %486 = vector.broadcast %184 : vector<1x128xi32> to vector<8x128xi32>
    %487 = vector.broadcast %485 : vector<8x1xi32> to vector<8x128xi32>
    %488 = arith.cmpi eq, %486, %487 : vector<8x128xi32>
    %489 = arith.extui %488 : vector<8x128xi1> to vector<8x128xi32>
    %490 = arith.sitofp %489 : vector<8x128xi32> to vector<8x128xf32>
    %491 = arith.truncf %490 : vector<8x128xf32> to vector<8x128xbf16>
    %492 = vector.broadcast %483 : vector<8x1xbf16> to vector<8x128xbf16>
    %493 = arith.mulf %492, %491 : vector<8x128xbf16>
    %494 = arith.addf %482, %493 : vector<8x128xbf16>
    %495 = vector.extract_strided_slice %172 {offsets = [0, 6], sizes = [8, 1], strides = [1, 1]} : vector<8x8xbf16> to vector<8x1xbf16>
    %c16_i32_75 = arith.constant 16 : i32
    %496 = vector.broadcast %c16_i32_75 : i32 to vector<8x1xi32>
    %497 = arith.addi %473, %496 : vector<8x1xi32>
    %498 = vector.broadcast %184 : vector<1x128xi32> to vector<8x128xi32>
    %499 = vector.broadcast %497 : vector<8x1xi32> to vector<8x128xi32>
    %500 = arith.cmpi eq, %498, %499 : vector<8x128xi32>
    %501 = arith.extui %500 : vector<8x128xi1> to vector<8x128xi32>
    %502 = arith.sitofp %501 : vector<8x128xi32> to vector<8x128xf32>
    %503 = arith.truncf %502 : vector<8x128xf32> to vector<8x128xbf16>
    %504 = vector.broadcast %495 : vector<8x1xbf16> to vector<8x128xbf16>
    %505 = arith.mulf %504, %503 : vector<8x128xbf16>
    %506 = arith.addf %494, %505 : vector<8x128xbf16>
    %507 = vector.extract_strided_slice %177 {offsets = [0, 6], sizes = [8, 1], strides = [1, 1]} : vector<8x8xbf16> to vector<8x1xbf16>
    %c16_i32_76 = arith.constant 16 : i32
    %508 = vector.broadcast %c16_i32_76 : i32 to vector<8x1xi32>
    %509 = arith.addi %473, %508 : vector<8x1xi32>
    %c1_i32_77 = arith.constant 1 : i32
    %510 = vector.broadcast %c1_i32_77 : i32 to vector<8x1xi32>
    %511 = arith.addi %509, %510 : vector<8x1xi32>
    %512 = vector.broadcast %184 : vector<1x128xi32> to vector<8x128xi32>
    %513 = vector.broadcast %511 : vector<8x1xi32> to vector<8x128xi32>
    %514 = arith.cmpi eq, %512, %513 : vector<8x128xi32>
    %515 = arith.extui %514 : vector<8x128xi1> to vector<8x128xi32>
    %516 = arith.sitofp %515 : vector<8x128xi32> to vector<8x128xf32>
    %517 = arith.truncf %516 : vector<8x128xf32> to vector<8x128xbf16>
    %518 = vector.broadcast %507 : vector<8x1xbf16> to vector<8x128xbf16>
    %519 = arith.mulf %518, %517 : vector<8x128xbf16>
    %520 = arith.addf %506, %519 : vector<8x128xbf16>
    %521 = vector.extract_strided_slice %180 {offsets = [0, 7], sizes = [8, 1], strides = [1, 1]} : vector<8x8xi32> to vector<8x1xi32>
    %522 = vector.extract_strided_slice %158 {offsets = [0, 7], sizes = [8, 1], strides = [1, 1]} : vector<8x8xbf16> to vector<8x1xbf16>
    %523 = vector.broadcast %184 : vector<1x128xi32> to vector<8x128xi32>
    %524 = vector.broadcast %521 : vector<8x1xi32> to vector<8x128xi32>
    %525 = arith.cmpi eq, %523, %524 : vector<8x128xi32>
    %526 = arith.extui %525 : vector<8x128xi1> to vector<8x128xi32>
    %527 = arith.sitofp %526 : vector<8x128xi32> to vector<8x128xf32>
    %528 = arith.truncf %527 : vector<8x128xf32> to vector<8x128xbf16>
    %529 = vector.broadcast %522 : vector<8x1xbf16> to vector<8x128xbf16>
    %530 = arith.mulf %529, %528 : vector<8x128xbf16>
    %531 = vector.extract_strided_slice %165 {offsets = [0, 7], sizes = [8, 1], strides = [1, 1]} : vector<8x8xbf16> to vector<8x1xbf16>
    %c1_i32_78 = arith.constant 1 : i32
    %532 = vector.broadcast %c1_i32_78 : i32 to vector<8x1xi32>
    %533 = arith.addi %521, %532 : vector<8x1xi32>
    %534 = vector.broadcast %184 : vector<1x128xi32> to vector<8x128xi32>
    %535 = vector.broadcast %533 : vector<8x1xi32> to vector<8x128xi32>
    %536 = arith.cmpi eq, %534, %535 : vector<8x128xi32>
    %537 = arith.extui %536 : vector<8x128xi1> to vector<8x128xi32>
    %538 = arith.sitofp %537 : vector<8x128xi32> to vector<8x128xf32>
    %539 = arith.truncf %538 : vector<8x128xf32> to vector<8x128xbf16>
    %540 = vector.broadcast %531 : vector<8x1xbf16> to vector<8x128xbf16>
    %541 = arith.mulf %540, %539 : vector<8x128xbf16>
    %542 = arith.addf %530, %541 : vector<8x128xbf16>
    %543 = vector.extract_strided_slice %172 {offsets = [0, 7], sizes = [8, 1], strides = [1, 1]} : vector<8x8xbf16> to vector<8x1xbf16>
    %c16_i32_79 = arith.constant 16 : i32
    %544 = vector.broadcast %c16_i32_79 : i32 to vector<8x1xi32>
    %545 = arith.addi %521, %544 : vector<8x1xi32>
    %546 = vector.broadcast %184 : vector<1x128xi32> to vector<8x128xi32>
    %547 = vector.broadcast %545 : vector<8x1xi32> to vector<8x128xi32>
    %548 = arith.cmpi eq, %546, %547 : vector<8x128xi32>
    %549 = arith.extui %548 : vector<8x128xi1> to vector<8x128xi32>
    %550 = arith.sitofp %549 : vector<8x128xi32> to vector<8x128xf32>
    %551 = arith.truncf %550 : vector<8x128xf32> to vector<8x128xbf16>
    %552 = vector.broadcast %543 : vector<8x1xbf16> to vector<8x128xbf16>
    %553 = arith.mulf %552, %551 : vector<8x128xbf16>
    %554 = arith.addf %542, %553 : vector<8x128xbf16>
    %555 = vector.extract_strided_slice %177 {offsets = [0, 7], sizes = [8, 1], strides = [1, 1]} : vector<8x8xbf16> to vector<8x1xbf16>
    %c16_i32_80 = arith.constant 16 : i32
    %556 = vector.broadcast %c16_i32_80 : i32 to vector<8x1xi32>
    %557 = arith.addi %521, %556 : vector<8x1xi32>
    %c1_i32_81 = arith.constant 1 : i32
    %558 = vector.broadcast %c1_i32_81 : i32 to vector<8x1xi32>
    %559 = arith.addi %557, %558 : vector<8x1xi32>
    %560 = vector.broadcast %184 : vector<1x128xi32> to vector<8x128xi32>
    %561 = vector.broadcast %559 : vector<8x1xi32> to vector<8x128xi32>
    %562 = arith.cmpi eq, %560, %561 : vector<8x128xi32>
    %563 = arith.extui %562 : vector<8x128xi1> to vector<8x128xi32>
    %564 = arith.sitofp %563 : vector<8x128xi32> to vector<8x128xf32>
    %565 = arith.truncf %564 : vector<8x128xf32> to vector<8x128xbf16>
    %566 = vector.broadcast %555 : vector<8x1xbf16> to vector<8x128xbf16>
    %567 = arith.mulf %566, %565 : vector<8x128xbf16>
    %568 = arith.addf %554, %567 : vector<8x128xbf16>
    %569 = tpu.concatenate %232, %280, %328, %376, %424, %472, %520, %568 in 0 : vector<8x128xbf16>, vector<8x128xbf16>, vector<8x128xbf16>, vector<8x128xbf16>, vector<8x128xbf16>, vector<8x128xbf16>, vector<8x128xbf16>, vector<8x128xbf16> -> vector<64x128xbf16>
    %c0_82 = arith.constant 0 : index
    %c0_83 = arith.constant 0 : index
    %c0_84 = arith.constant 0 : index
    %c0_85 = arith.constant 0 : index
    %570 = vector.load %arg7[%c0_82, %c0_83, %c0_84, %c0_85] : memref<1x1x32x128xbf16, #tpu.memory_space<vmem>>, vector<1x1x32x128xbf16>
    %571 = vector.shape_cast %570 : vector<1x1x32x128xbf16> to vector<32x128xbf16>
    %cst_86 = arith.constant dense<0.000000e+00> : vector<64x32xf32>
    %572 = tpu.matmul %569, %571, %cst_86 {dimension_numbers = #tpu.dot_dimension_numbers<[1], [1], [0], [0], [0, 0, 1, 0], [], []>} : vector<64x128xbf16>, vector<32x128xbf16>, vector<64x32xf32> -> vector<64x32xf32>
    %c0_87 = arith.constant 0 : index
    %c0_88 = arith.constant 0 : index
    %c0_89 = arith.constant 0 : index
    %c0_90 = arith.constant 0 : index
    %573 = vector.load %arg8[%c0_87, %c0_88, %c0_89, %c0_90] : memref<1x8x8x32xf32, #tpu.memory_space<vmem>>, vector<1x1x8x32xf32>
    %574 = vector.shape_cast %573 : vector<1x1x8x32xf32> to vector<8x32xf32>
    %575 = vector.extract_strided_slice %572 {offsets = [0, 0], sizes = [8, 32], strides = [1, 1]} : vector<64x32xf32> to vector<8x32xf32>
    %576 = arith.addf %574, %575 : vector<8x32xf32>
    %c0_91 = arith.constant 0 : index
    %c0_92 = arith.constant 0 : index
    %c0_93 = arith.constant 0 : index
    %c0_94 = arith.constant 0 : index
    %577 = vector.load %arg8[%c0_91, %c0_92, %c0_93, %c0_94] : memref<1x8x8x32xf32, #tpu.memory_space<vmem>>, vector<1x1x8x32xf32>
    %578 = vector.shape_cast %577 : vector<1x1x8x32xf32> to vector<8x32xf32>
    %579 = vector.shape_cast %576 : vector<8x32xf32> to vector<1x1x8x32xf32>
    tpu.vector_store %arg8[%c0_91, %c0_92, %c0_93, %c0_94], %579 {strides = array<i32>} : memref<1x8x8x32xf32, #tpu.memory_space<vmem>>, vector<1x1x8x32xf32>,
    %c0_95 = arith.constant 0 : index
    %c1 = arith.constant 1 : index
    %c0_96 = arith.constant 0 : index
    %c0_97 = arith.constant 0 : index
    %580 = vector.load %arg8[%c0_95, %c1, %c0_96, %c0_97] : memref<1x8x8x32xf32, #tpu.memory_space<vmem>>, vector<1x1x8x32xf32>
    %581 = vector.shape_cast %580 : vector<1x1x8x32xf32> to vector<8x32xf32>
    %582 = vector.extract_strided_slice %572 {offsets = [8, 0], sizes = [8, 32], strides = [1, 1]} : vector<64x32xf32> to vector<8x32xf32>
    %583 = arith.addf %581, %582 : vector<8x32xf32>
    %c0_98 = arith.constant 0 : index
    %c1_99 = arith.constant 1 : index
    %c0_100 = arith.constant 0 : index
    %c0_101 = arith.constant 0 : index
    %584 = vector.load %arg8[%c0_98, %c1_99, %c0_100, %c0_101] : memref<1x8x8x32xf32, #tpu.memory_space<vmem>>, vector<1x1x8x32xf32>
    %585 = vector.shape_cast %584 : vector<1x1x8x32xf32> to vector<8x32xf32>
    %586 = vector.shape_cast %583 : vector<8x32xf32> to vector<1x1x8x32xf32>
    tpu.vector_store %arg8[%c0_98, %c1_99, %c0_100, %c0_101], %586 {strides = array<i32>} : memref<1x8x8x32xf32, #tpu.memory_space<vmem>>, vector<1x1x8x32xf32>,
    %c0_102 = arith.constant 0 : index
    %c2 = arith.constant 2 : index
    %c0_103 = arith.constant 0 : index
    %c0_104 = arith.constant 0 : index
    %587 = vector.load %arg8[%c0_102, %c2, %c0_103, %c0_104] : memref<1x8x8x32xf32, #tpu.memory_space<vmem>>, vector<1x1x8x32xf32>
    %588 = vector.shape_cast %587 : vector<1x1x8x32xf32> to vector<8x32xf32>
    %589 = vector.extract_strided_slice %572 {offsets = [16, 0], sizes = [8, 32], strides = [1, 1]} : vector<64x32xf32> to vector<8x32xf32>
    %590 = arith.addf %588, %589 : vector<8x32xf32>
    %c0_105 = arith.constant 0 : index
    %c2_106 = arith.constant 2 : index
    %c0_107 = arith.constant 0 : index
    %c0_108 = arith.constant 0 : index
    %591 = vector.load %arg8[%c0_105, %c2_106, %c0_107, %c0_108] : memref<1x8x8x32xf32, #tpu.memory_space<vmem>>, vector<1x1x8x32xf32>
    %592 = vector.shape_cast %591 : vector<1x1x8x32xf32> to vector<8x32xf32>
    %593 = vector.shape_cast %590 : vector<8x32xf32> to vector<1x1x8x32xf32>
    tpu.vector_store %arg8[%c0_105, %c2_106, %c0_107, %c0_108], %593 {strides = array<i32>} : memref<1x8x8x32xf32, #tpu.memory_space<vmem>>, vector<1x1x8x32xf32>,
    %c0_109 = arith.constant 0 : index
    %c3 = arith.constant 3 : index
    %c0_110 = arith.constant 0 : index
    %c0_111 = arith.constant 0 : index
    %594 = vector.load %arg8[%c0_109, %c3, %c0_110, %c0_111] : memref<1x8x8x32xf32, #tpu.memory_space<vmem>>, vector<1x1x8x32xf32>
    %595 = vector.shape_cast %594 : vector<1x1x8x32xf32> to vector<8x32xf32>
    %596 = vector.extract_strided_slice %572 {offsets = [24, 0], sizes = [8, 32], strides = [1, 1]} : vector<64x32xf32> to vector<8x32xf32>
    %597 = arith.addf %595, %596 : vector<8x32xf32>
    %c0_112 = arith.constant 0 : index
    %c3_113 = arith.constant 3 : index
    %c0_114 = arith.constant 0 : index
    %c0_115 = arith.constant 0 : index
    %598 = vector.load %arg8[%c0_112, %c3_113, %c0_114, %c0_115] : memref<1x8x8x32xf32, #tpu.memory_space<vmem>>, vector<1x1x8x32xf32>
    %599 = vector.shape_cast %598 : vector<1x1x8x32xf32> to vector<8x32xf32>
    %600 = vector.shape_cast %597 : vector<8x32xf32> to vector<1x1x8x32xf32>
    tpu.vector_store %arg8[%c0_112, %c3_113, %c0_114, %c0_115], %600 {strides = array<i32>} : memref<1x8x8x32xf32, #tpu.memory_space<vmem>>, vector<1x1x8x32xf32>,
    %c0_116 = arith.constant 0 : index
    %c4 = arith.constant 4 : index
    %c0_117 = arith.constant 0 : index
    %c0_118 = arith.constant 0 : index
    %601 = vector.load %arg8[%c0_116, %c4, %c0_117, %c0_118] : memref<1x8x8x32xf32, #tpu.memory_space<vmem>>, vector<1x1x8x32xf32>
    %602 = vector.shape_cast %601 : vector<1x1x8x32xf32> to vector<8x32xf32>
    %603 = vector.extract_strided_slice %572 {offsets = [32, 0], sizes = [8, 32], strides = [1, 1]} : vector<64x32xf32> to vector<8x32xf32>
    %604 = arith.addf %602, %603 : vector<8x32xf32>
    %c0_119 = arith.constant 0 : index
    %c4_120 = arith.constant 4 : index
    %c0_121 = arith.constant 0 : index
    %c0_122 = arith.constant 0 : index
    %605 = vector.load %arg8[%c0_119, %c4_120, %c0_121, %c0_122] : memref<1x8x8x32xf32, #tpu.memory_space<vmem>>, vector<1x1x8x32xf32>
    %606 = vector.shape_cast %605 : vector<1x1x8x32xf32> to vector<8x32xf32>
    %607 = vector.shape_cast %604 : vector<8x32xf32> to vector<1x1x8x32xf32>
    tpu.vector_store %arg8[%c0_119, %c4_120, %c0_121, %c0_122], %607 {strides = array<i32>} : memref<1x8x8x32xf32, #tpu.memory_space<vmem>>, vector<1x1x8x32xf32>,
    %c0_123 = arith.constant 0 : index
    %c5 = arith.constant 5 : index
    %c0_124 = arith.constant 0 : index
    %c0_125 = arith.constant 0 : index
    %608 = vector.load %arg8[%c0_123, %c5, %c0_124, %c0_125] : memref<1x8x8x32xf32, #tpu.memory_space<vmem>>, vector<1x1x8x32xf32>
    %609 = vector.shape_cast %608 : vector<1x1x8x32xf32> to vector<8x32xf32>
    %610 = vector.extract_strided_slice %572 {offsets = [40, 0], sizes = [8, 32], strides = [1, 1]} : vector<64x32xf32> to vector<8x32xf32>
    %611 = arith.addf %609, %610 : vector<8x32xf32>
    %c0_126 = arith.constant 0 : index
    %c5_127 = arith.constant 5 : index
    %c0_128 = arith.constant 0 : index
    %c0_129 = arith.constant 0 : index
    %612 = vector.load %arg8[%c0_126, %c5_127, %c0_128, %c0_129] : memref<1x8x8x32xf32, #tpu.memory_space<vmem>>, vector<1x1x8x32xf32>
    %613 = vector.shape_cast %612 : vector<1x1x8x32xf32> to vector<8x32xf32>
    %614 = vector.shape_cast %611 : vector<8x32xf32> to vector<1x1x8x32xf32>
    tpu.vector_store %arg8[%c0_126, %c5_127, %c0_128, %c0_129], %614 {strides = array<i32>} : memref<1x8x8x32xf32, #tpu.memory_space<vmem>>, vector<1x1x8x32xf32>,
    %c0_130 = arith.constant 0 : index
    %c6 = arith.constant 6 : index
    %c0_131 = arith.constant 0 : index
    %c0_132 = arith.constant 0 : index
    %615 = vector.load %arg8[%c0_130, %c6, %c0_131, %c0_132] : memref<1x8x8x32xf32, #tpu.memory_space<vmem>>, vector<1x1x8x32xf32>
    %616 = vector.shape_cast %615 : vector<1x1x8x32xf32> to vector<8x32xf32>
    %617 = vector.extract_strided_slice %572 {offsets = [48, 0], sizes = [8, 32], strides = [1, 1]} : vector<64x32xf32> to vector<8x32xf32>
    %618 = arith.addf %616, %617 : vector<8x32xf32>
    %c0_133 = arith.constant 0 : index
    %c6_134 = arith.constant 6 : index
    %c0_135 = arith.constant 0 : index
    %c0_136 = arith.constant 0 : index
    %619 = vector.load %arg8[%c0_133, %c6_134, %c0_135, %c0_136] : memref<1x8x8x32xf32, #tpu.memory_space<vmem>>, vector<1x1x8x32xf32>
    %620 = vector.shape_cast %619 : vector<1x1x8x32xf32> to vector<8x32xf32>
    %621 = vector.shape_cast %618 : vector<8x32xf32> to vector<1x1x8x32xf32>
    tpu.vector_store %arg8[%c0_133, %c6_134, %c0_135, %c0_136], %621 {strides = array<i32>} : memref<1x8x8x32xf32, #tpu.memory_space<vmem>>, vector<1x1x8x32xf32>,
    %c0_137 = arith.constant 0 : index
    %c7 = arith.constant 7 : index
    %c0_138 = arith.constant 0 : index
    %c0_139 = arith.constant 0 : index
    %622 = vector.load %arg8[%c0_137, %c7, %c0_138, %c0_139] : memref<1x8x8x32xf32, #tpu.memory_space<vmem>>, vector<1x1x8x32xf32>
    %623 = vector.shape_cast %622 : vector<1x1x8x32xf32> to vector<8x32xf32>
    %624 = vector.extract_strided_slice %572 {offsets = [56, 0], sizes = [8, 32], strides = [1, 1]} : vector<64x32xf32> to vector<8x32xf32>
    %625 = arith.addf %623, %624 : vector<8x32xf32>
    %c0_140 = arith.constant 0 : index
    %c7_141 = arith.constant 7 : index
    %c0_142 = arith.constant 0 : index
    %c0_143 = arith.constant 0 : index
    %626 = vector.load %arg8[%c0_140, %c7_141, %c0_142, %c0_143] : memref<1x8x8x32xf32, #tpu.memory_space<vmem>>, vector<1x1x8x32xf32>
    %627 = vector.shape_cast %626 : vector<1x1x8x32xf32> to vector<8x32xf32>
    %628 = vector.shape_cast %625 : vector<8x32xf32> to vector<1x1x8x32xf32>
    tpu.vector_store %arg8[%c0_140, %c7_141, %c0_142, %c0_143], %628 {strides = array<i32>} : memref<1x8x8x32xf32, #tpu.memory_space<vmem>>, vector<1x1x8x32xf32>,
    return
  }
  func.func @transform_0(%arg0: i32, %arg1: i32, %arg2: i32, %arg3: i32) -> (i32, i32, i32) {
    %c0_i32 = arith.constant 0 : i32
    %c0_i32_0 = arith.constant 0 : i32
    return %arg0, %arg1, %c0_i32 : i32, i32, i32
  }
  func.func @transform_1(%arg0: i32, %arg1: i32, %arg2: i32, %arg3: i32) -> (i32, i32, i32) {
    %c0_i32 = arith.constant 0 : i32
    %c0_i32_0 = arith.constant 0 : i32
    return %arg0, %arg1, %c0_i32 : i32, i32, i32
  }
  func.func @transform_2(%arg0: i32, %arg1: i32, %arg2: i32, %arg3: i32) -> i32 {
    %c0_i32 = arith.constant 0 : i32
    %c0_i32_0 = arith.constant 0 : i32
    return %c0_i32 : i32
  }
  func.func @transform_3(%arg0: i32, %arg1: i32, %arg2: i32, %arg3: i32) -> (i32, i32, i32, i32) {
    %c0_i32 = arith.constant 0 : i32
    %c0_i32_0 = arith.constant 0 : i32
    return %arg0, %arg2, %c0_i32, %arg3 : i32, i32, i32, i32
  }
  func.func @transform_4(%arg0: i32, %arg1: i32, %arg2: i32, %arg3: i32) -> (i32, i32, i32, i32) {
    %c0_i32 = arith.constant 0 : i32
    %c0_i32_0 = arith.constant 0 : i32
    %c0_i32_1 = arith.constant 0 : i32
    return %arg0, %c0_i32, %arg1, %c0_i32_0 : i32, i32, i32, i32
  }
  func.func @transform_5(%arg0: i32, %arg1: i32, %arg2: i32, %arg3: i32) -> (i32, i32, i32) {
    %c0_i32 = arith.constant 0 : i32
    %c0_i32_0 = arith.constant 0 : i32
    return %arg0, %arg1, %c0_i32 : i32, i32, i32
  }
}

</mosaic_0001>

<bundles_post_ra>
// kernel: gaussian_cross_attention.1
= control target key start
LH: loop header
LB: loop body
LE: loop exit
PB: predicated region body
PF: predicated region fallthrough
CT: control target
= control target key end

     0   :  { %s2631_s0 = inlined_call_operand.vmem [shape: f32[2,8,10], index: 0, kind: input, shape index: {}]   ;;  %s2632_s1 = inlined_call_operand.vmem [shape: f32[2,8,24], index: 1, kind: input, shape index: {}]   ;;  %s2633_s2 = inlined_call_operand.vmem [shape: f32[64], index: 2, kind: input, shape index: {}]   ;;  %s2634_s3 = inlined_call_operand.vmem [shape: bf16[2,2,32,256], index: 3, kind: input, shape index: {}]   ;;  %s2635_s4 = inlined_call_operand.vmem [shape: f32[2,8,8,32], index: 4, kind: output, shape index: {0}]   ;;  %s2636_s5 = inlined_call_operand.vmem [shape: f32[2,8,24], index: 5, kind: output, shape index: {1}]  }
   0x1   :  { %2638 = sst [smem:[#allocation7_spill]] %s2631_s0 }
   0x2   :  { %2639 = sst [smem:[#allocation8_spill]] %s2632_s1 }
   0x3   :  { %2640 = sst [smem:[#allocation9_spill]] %s2633_s2 }
   0x4   :  { %2641 = sst [smem:[#allocation10_spill]] %s2634_s3 }
   0x5   :  { %11 = vsyncpa [#allocation3], 0  ;;  %s2035_s18 = smov 0   ;;  %s2037_s19 = smov 0  }
   0x6   :  { %s2039_s20 = smov 0   ;;  %s2041_s21 = smov 0  }
   0x7   :  { %s2043_s22 = smov 0   ;;  %s2045_s23 = smov 0  }
   0x8   :  { %s2047_s24 = smov 0   ;;  %s2049_s25 = smov 0  }
   0x9   :  { %s2051_s26 = smov 0  }
   0xa LB: > { %s1578_s27 = sadd.s32 4294967295, %s1973_s26   ;;  %s32_s28 = sadd.s32 1, %s1961_s23  ;;  %s1973_s26 = sphi %s2051_s26, %s17_s26   ;;  %s1969_s25 = sphi %s2049_s25, %s2663_s25   ;;  %s1965_s24 = sphi %s2047_s24, %s2662_s24   ;;  %s1961_s23 = sphi %s2045_s23, %s2661_s23   ;;  %s1957_s22 = sphi %s2043_s22, %s2660_s22   ;;  %s1953_s21 = sphi %s2041_s21, %s2659_s21   ;;  %s1949_s20 = sphi %s2039_s20, %s2658_s20   ;;  %s1945_s19 = sphi %s2037_s19, %s2657_s19   ;;  %s1941_s18 = sphi %s2035_s18, %s2656_s18  }
   0xb   : > { %p33_p0 = scmp.ge.s32.totalorder %s32_s28, 2  ;;  %s35_s29 = sadd.s32 1, %s1965_s24 }
   0xc   : > { %s43_s30 = sadd.s32 1, %s1969_s25  ;;  %p138_p1 = scmp.ne.s32.totalorder %s1945_s19, %s1941_s18 }
   0xd   : > { %s2665_s28 = smov (%p33_p0, %s32_s28), 0  ;;  %s2667_s29 = smov (!%p33_p0, %s35_s29), %s1965_s24 }
   0xe   : > { %s127_s7 = ssub.s32 %s1961_s23, %s2665_s28  ;;  %p37_p2 = scmp.ge.s32.totalorder %s2667_s29, 2 }
   0xf   : > { %p139_p3 = scmp.eq.s32.totalorder %s1973_s26, 0  ;;  %p1580_p4 = scmp.ge.s32.totalorder %s1973_s26, 1 }
  0x10   : > { %p211_p5 = scmp.lt.s32.totalorder %s1973_s26, 9  ;;  %s2669_s29 = smov (%p37_p2, %s2667_s29), 0 }
  0x11   : > { %s2671_s30 = smov (!%p37_p2, %s43_s30), %s1969_s25  ;;  %s125_s8 = ssub.s32 %s1965_s24, %s2669_s29 }
  0x12   : > { %p2100_p6 = por %p139_p3, %p138_p1  ;;  %p45_p7 = scmp.ge.s32.totalorder %s2671_s30, 2 }
  0x13   : > { %p2104_p8 = pnand %p1580_p4, %p211_p5  ;;  %p2108_p9 = scmp.eq.s32.totalorder %s1578_s27, 0 }
  0x14   : > { %s2673_s30 = smov (%p45_p7, %s2671_s30), 0  ;;  %s2646_s2 = sld [smem:[#allocation9_spill]] }
  0x15   : > { %2645 = sst [smem:[#allocation6_spill]] %s2673_s30  ;;  %p1687_p10 = pneg %p2104_p8 }
  0x16   : > { %s124_s15 = ssub.s32 %s1969_s25, %s2673_s30 }
  0x17   : > { %s126_s16 = sor.u32 %s125_s8, %s124_s15  ;;  %p2123_p11 = pnand %p2108_p9, %p1687_p10 }
  0x18   : > { %s128_s27 = sor.u32 %s127_s7, %s126_s16 }
  0x19   : > { %p129_p12 = scmp.eq.s32.totalorder %s128_s27, 0  ;;  %p1886_p0 = pneg %p2123_p11 }
  0x1a   : > { %s224_s14 = sshll.u32 %s2646_s2, 4  ;;  %s225_s14 = int_to_ptr.vmem [resolvable:$true] %s224_s14 }
  0x1b   : > { %s1884_s6 = scalar_lea.vmem %s225_s14, 16  ;;  %p1892_p3 = scmp.lt.s32.totalorder %s225_s14, %s225_s14 }
  0x1c   : > { %p1885_p13 = scmp.ne.s32.totalorder %s225_s14, %s1884_s6  ;;  %p1893_p4 = scmp.lt.s32.totalorder %s1884_s6, %s1884_s6 }
  0x1e   : > { %p1887_p1 = pnand %p1886_p0, %p1885_p13  ;;  %p1894_p5 = por %p1893_p4, %p1892_p3 }
  0x20   : > { %p1888_p2 = pneg %p1887_p1 }
  0x22   : > { %p1895_p7 = pnand %p1894_p5, %p1888_p2 }
  0x24   : > { %1898 = shalt.err (!%p1895_p7)
}
  0x25   : > { %s1975_s8 = smov [#allocation2]   ;;  %s2648_s12 = sadd.s32 1, %s1945_s19 }
  0x26   : > { %1690 = dma.vmem_to_smem (!%p2123_p11), %s225_s14, 16, %s1975_s8, [#allocation3]  }
  0x27   : > { %s2134_s7 = scalar_select %p129_p12, %s1945_s19, %s2648_s12  }
  0x28   : > { %p1582_p10 = scmp.ge.s32.totalorder %s1973_s26, 8 }
  0x2a   : > { %231 = sbr.rel (%p1582_p10) target bundleno = 60 (0x3c), region = 20 }
  0x2f   : > { %254 = sbr.rel (!%p2100_p6) target bundleno = 60 (0x3c), region = 32  ;;  %s256_s6 = sand.u32 (%p2100_p6), 1, %s1945_s19  }
  0x30   : > { %s1584_s13 = sshll.u32 (%p2100_p6), %s1965_s24, 3  ;;  %s1583_s15 = sshll.u32 (%p2100_p6), %s256_s6, 4 }
  0x31   : > { %s260_s16 = sadd.s32 (%p2100_p6), %s1961_s23, %s1584_s13  ;;  %s1585_s17 = sshll.u32 (%p2100_p6), %s1969_s25, 4 }
  0x32   : > { %s262_s27 = sadd.s32 (%p2100_p6), %s1585_s17, %s260_s16  ;;  %s2649_s3 = sld [smem:[#allocation10_spill]] (%p2100_p6) }
  0x33   : > { %s1586_s14 = sshll.u32 (%p2100_p6), %s262_s27, 2  ;;  %s258_s9 = scalar_lea.vmem (%p2100_p6), [#allocation4], %s1583_s15 }
  0x38   : > { %s264_s2 = scalar_lea.vmem %s2649_s3, %s1586_s14 }
  0x39   : > { %v281_v0 = vld [vmem:[%s264_s2] sm:$0xf]  ;;  %v283_v1 = vld [vmem:[%s264_s2 + $0x8] sm:$0xf]  ;;  %v285_v2 = vld [vmem:[%s264_s2 + $0x10] sm:$0xf] }
  0x3a   : > { %282 = vst [vmem:[%s258_s9] sm:$0xf] %v281_v0  ;;  %284 = vst [vmem:[%s258_s9 + $0x4] sm:$0xf] %v283_v1  ;;  %v287_v3 = vld [vmem:[%s264_s2 + $0x18] sm:$0xf] }
  0x3b   : > { %286 = vst [vmem:[%s258_s9 + $0x8] sm:$0xf] %v285_v2  ;;  %288 = vst [vmem:[%s258_s9 + $0xc] sm:$0xf] %v287_v3 }
  0x3c PF: > { %323 = sbr.rel (%p2104_p8) target bundleno = 1557 (0x615), region = 73 }
  0x41   : > { %1936 = dma.done.wait (%p2108_p9), [#allocation3], 16  }
  0x42   : > { %1938 = vsyncadd (%p2108_p9), [#allocation3], 4294967280  ;;  %s330_s6 = sand.u32 1, %s1941_s18  }
  0x43   : > { %s2153_s13 = sshll.u32 %s330_s6, 4 }
  0x44   : > { %336 = sfence }
  0x45   : > { %p382_p6 = scmp.lt.s32.totalorder %s1957_s22, 1  ;;  %p412_p11 = scmp.eq.s32.totalorder %s1953_s21, 0 }
  0x46   : > { %p413_p8 = scmp.eq.s32.totalorder %s1949_s20, 0  ;;  %s2650_s0 = sld [smem:[#allocation7_spill]] }
  0x47   : > { %s383_s2 = scalar_select %p382_p6, %s1957_s22, 1 }
  0x48   : > { %p414_p12 = pnand %p413_p8, %p412_p11  ;;  %s2651_s1 = sld [smem:[#allocation8_spill]] }
  0x49   : > { %s2160_s10 = sshll.u32 %s383_s2, 3  ;;  %s1656_s18 = sshll.u32 %s383_s2, 6 }
  0x4a   : > { %s2173_s6 = scalar_lea.vmem %s2635_s4, %s1656_s18  ;;  %s2179_s30 = scalar_lea.vmem %s2636_s5, %s2160_s10 }
  0x4b   : > { %417 = sbr.rel (%p414_p12) target bundleno = 850 (0x352), region = 85  ;;  %s1976_s2 = smov (!%p414_p12), 127  }
  0x4c   : > { %s388_s17 = scalar_lea.vmem %s2650_s0, %s2160_s10  ;;  %s1977_s11 = smov (!%p414_p12), 125  }
  0x4d   : > { %s1978_s16 = smov (!%p414_p12), 126   ;;  %s1979_s3 = smov (!%p414_p12), 1  }
  0x4e   : > { %s395_s8 = scalar_lea.vmem %s2651_s1, %s2160_s10  ;;  %s1980_s15 = smov (!%p414_p12), 3  }
  0x4f   : > { %s1981_s18 = smov (!%p414_p12), 2   ;;  %s1985_s27 = smov (!%p414_p12), 5  }
  0x50   : > { %v2181_v4 = vld [vmem:[%s388_s17] sm:$0xff]  ;;  %v1982_v30 = vmov 7   ;;  %v1983_v31 = vmov 8   ;;  %s1984_s17 = smov 4   ;;  %s1989_s9 = smov 120   ;;  %vm683_vm2 = vcmask 261120  }
  0x51   : > { %v431_v5 = vmul.f32 %v2181_v4, %v2181_v4  ;;  %v1595_v20 = vmul.f32 -1.442695, %v2181_v4  ;;  %1796 = vset.pattern.permute.xlu0 %v1982_v30  ;;  %1795 = vset.pattern.permute.xlu1 %v1983_v31  ;;  %s1992_s10 = smov 16   ;;  %vm677_vm3 = vcmask 64512   ;;  %vm679_vm4 = vcmask 130048  }
  0x52   : > { %vm681_vm5 = vcmask 195584  }
  0x53   : > { %433 = vrot.lane.b32.xlu0 %v431_v5, %s1976_s2  ;;  %441 = vrot.lane.b32.xlu1 %v431_v5, %s1977_s11 }
  0x57   : > { %437 = vrot.lane.b32.xlu0 %v431_v5, %s1978_s16 }
  0xc5   : > { %v434_v6 = vpop.permute.xlu0 %433  ;;  %v442_v9 = vpop.permute.xlu1 %441 }
  0xc6   : > { %v436_v7 = vadd.f32 %v434_v6, %v431_v5 }
  0xc9   : > { %v438_v8 = vpop.permute.xlu0 %437 }
  0xca   : > { %v440_v10 = vadd.f32 %v438_v8, %v436_v7 }
  0xcc   : > { %v444_v11 = vadd.f32 %v442_v9, %v440_v10 }
  0xce   : > { %1804 = vrsqrt.f32 %v444_v11  ;;  %vm447_vm0 = vcmp.eq.f32.partialorder %v444_v11, inf  ;;  %v450_v14 = vand.u32 2147483648, %v444_v11  ;;  %vm449_vm1 = vcmp.eq.f32.partialorder %v444_v11, 0.0 }
  0xdb   : > { %v1805_v12 = vpop.eup %1804 }
  0xdc   : > { %v446_v13 = vmul.f32 %v1805_v12, %v444_v11 }
  0xde   : > { %v448_v15 = vsel %vm447_vm0, %v444_v11, %v446_v13 }
  0xdf   : > { %v451_v16 = vsel %vm449_vm1, %v450_v14, %v448_v15 }
  0xe0   : > { %v452_v17 = vmax.f32 %v451_v16, 1e-12 }
  0xe2   : > { %456 = vrot.lane.b32.xlu0 %v452_v17, %s1979_s3  ;;  %1806 = vrcp.f32 %v452_v17  ;;  %466 = vrot.lane.b32.xlu1 %v452_v17, %s1980_s15 }
  0xe3   : > { %1808 = vpow2.f32 %v1595_v20 }
  0xe6   : > { %461 = vrot.lane.b32.xlu1 %v452_v17, %s1981_s18 }
  0xef   : > { %v1807_v18 = vpop.eup %1806 }
  0xf0   : > { %v454_v19 = vmul.f32 %v1807_v18, %v2181_v4  ;;  %v1809_v21 = vpop.eup %1808  ;;  %v421_v18 = vmul.f32 8.0, %v2181_v4 }
  0xf1   : > { %v426_v22 = vadd.f32 1.0, %v1809_v21 }
  0xf2   : > { %486 = vrot.lane.b32.xlu1 %v454_v19, %s1980_s15  ;;  %524 = vrot.lane.b32.xlu0 %v454_v19, %s1979_s3 }
  0xf6   : > { %501 = vrot.lane.b32.xlu0 %v454_v19, %s1981_s18  ;;  %v419_v19 = vmul.f32 100.0, %v2181_v4 }
 0x154   : > { %v457_v23 = vpop.permute.xlu0 %456  ;;  %v467_v24 = vpop.permute.xlu1 %466 }
 0x155   : > { %1810 = vrcp.f32 %v457_v23  ;;  %v422_v23 = vadd.f32 -5.0, %v421_v18 }
 0x156   : > { %1812 = vrcp.f32 %v467_v24  ;;  %v420_v24 = vadd.f32 -50.0, %v419_v19 }
 0x157   : > { %1814 = vrcp.f32 %v426_v22 }
 0x158   : > { %v462_v25 = vpop.permute.xlu1 %461 }
 0x159   : > { %1816 = vrcp.f32 %v462_v25 }
 0x162   : > { %v1811_v26 = vpop.eup %1810 }
 0x163   : > { %v1813_v27 = vpop.eup %1812  ;;  %v460_v33 = vmul.f32 %v1811_v26, %v2181_v4  ;;  %v1986_v26 = vmov 2  }
 0x164   : > { %v1815_v28 = vpop.eup %1814  ;;  %v470_v29 = vmul.f32 %v1813_v27, %v2181_v4  ;;  %v525_v35 = vpop.permute.xlu0 %524  ;;  %v1987_v27 = vmov 1  }
 0x165   : > { %v429_v37 = vmul.f32 1.9, %v1815_v28  ;;  %v527_v39 = vmul.f32 %v525_v35, %v460_v33  ;;  %v487_v41 = vpop.permute.xlu1 %486  ;;  %v513_v46 = vmul.f32 %v460_v33, %v460_v33 }
 0x166   : > { %v1817_v32 = vpop.eup %1816  ;;  %520 = vrot.lane.b32.xlu0 %v470_v29, %s1976_s2  ;;  %v472_v34 = vmul.f32 %v470_v29, %v470_v29  ;;  %v489_v42 = vmul.f32 %v487_v41, %v470_v29 }
 0x167   : > { %v465_v36 = vmul.f32 %v1817_v32, %v2181_v4  ;;  %v430_v40 = vadd.f32 0.1, %v429_v37  ;;  %v1988_v4 = vmov 0  }
 0x168   : > { %514 = vrot.lane.b32.xlu1 %v472_v34, %s1978_s16  ;;  %v502_v43 = vpop.permute.xlu0 %501 }
 0x169   : > { %v2202_v38 = vmul.f32 %v465_v36, %v465_v36  ;;  %v504_v44 = vmul.f32 %v502_v43, %v465_v36 }
 0x16b   : > { %539 = vrot.lane.b32.xlu0 %v2202_v38, %s1976_s2 }
 0x16c   : > { %529 = vrot.lane.b32.xlu1 %v527_v39, %s1979_s3 }
 0x16f   : > { %593 = vrot.lane.b32.xlu0 %v430_v40, %s1984_s17 }
 0x170   : > { %563 = vrot.lane.b32.xlu1 %v430_v40, %s1980_s15 }
 0x173   : > { %481 = vrot.lane.b32.xlu0 %v465_v36, %s1976_s2 }
 0x174   : > { %578 = vrot.lane.b32.xlu1 %v430_v40, %s1981_s18 }
 0x177   : > { %491 = vrot.lane.b32.xlu0 %v489_v42, %s1978_s16 }
 0x178   : > { %497 = vrot.lane.b32.xlu1 %v470_v29, %s1978_s16  ;;  %v545_v29 = vld [vmem:[%s395_s8] sm:$0xff]  ;;  %s1993_s8 = smov 8  }
 0x17c   : > { %506 = vrot.lane.b32.xlu1 %v504_v44, %s1976_s2 }
 0x1d8   : > { %v521_v45 = vpop.permute.xlu0 %520 }
 0x1d9   : > { %v523_v49 = vmul.f32 %v521_v45, %v465_v36 }
 0x1da   : > { %v515_v47 = vpop.permute.xlu1 %514 }
 0x1db   : > { %v517_v48 = vadd.f32 %v515_v47, %v513_v46 }
 0x1dd   : > { %v518_v50 = vmul.f32 2.0, %v517_v48  ;;  %v540_v51 = vpop.permute.xlu0 %539 }
 0x1de   : > { %v530_v52 = vpop.permute.xlu1 %529  ;;  %v542_v53 = vadd.f32 %v540_v51, %v513_v46 }
 0x1df   : > { %v532_v54 = vsub.f32 %v523_v49, %v530_v52  ;;  %v536_v55 = vadd.f32 %v530_v52, %v523_v49  ;;  %v519_v56 = vsub.f32 1.0, %v518_v50 }
 0x1e0   : > { %v543_v58 = vmul.f32 2.0, %v542_v53  ;;  %v1991_v53 = vmov 0.0  }
 0x1e1   : > { %v537_v57 = vmul.f32 2.0, %v536_v55  ;;  %v594_v59 = vpop.permute.xlu0 %593  ;;  %v533_v61 = vmul.f32 2.0, %v532_v54  ;;  %684 = vst.msk [vmem:[%s2173_s6] sm:$0xff] %vm683_vm2, %v1991_v53  ;;  %685 = vst.msk [vmem:[%s2173_s6 + $0x8] sm:$0xff] %vm683_vm2, %v1991_v53 }
 0x1e2   : > { %v564_v60 = vpop.permute.xlu1 %563  ;;  %v544_v0 = vsub.f32 1.0, %v543_v58  ;;  %686 = vst.msk [vmem:[%s2173_s6 + $0x10] sm:$0xff] %vm683_vm2, %v1991_v53  ;;  %687 = vst.msk [vmem:[%s2173_s6 + $0x18] sm:$0xff] %vm683_vm2, %v1991_v53 }
 0x1e3   : > { %v645_v62 = vmul.f32 %v594_v59, %v537_v57  ;;  %v608_v63 = vmul.f32 %v564_v60, %v519_v56  ;;  %v620_v3 = vmul.f32 %v564_v60, %v533_v61  ;;  %688 = vst.msk [vmem:[%s2173_s6 + $0x20] sm:$0xff] %vm683_vm2, %v1991_v53  ;;  %689 = vst.msk [vmem:[%s2173_s6 + $0x28] sm:$0xff] %vm683_vm2, %v1991_v53 }
 0x1e4   : > { %690 = vst.msk [vmem:[%s2173_s6 + $0x30] sm:$0xff] %vm683_vm2, %v1991_v53  ;;  %691 = vst.msk [vmem:[%s2173_s6 + $0x38] sm:$0xff] %vm683_vm2, %v1991_v53 }
 0x1e5   : > { %648 = vperm.xlu1 %1795, %v645_v62   ;;  %611 = vperm.xlu0 %1796, %v608_v63   ;;  %v482_v1 = vpop.permute.xlu0 %481 }
 0x1e6   : > { %v579_v2 = vpop.permute.xlu1 %578  ;;  %v484_v6 = vmul.f32 %v482_v1, %v460_v33 }
 0x1e7   : > { %v657_v5 = vmul.f32 %v579_v2, %v544_v0 }
 0x1e9   : > { %623 = vperm.xlu1 %1795, %v620_v3   ;;  %660 = vperm.xlu0 %1796, %v657_v5   ;;  %v492_v7 = vpop.permute.xlu0 %491 }
 0x1ea   : > { %v511_v8 = vadd.f32 %v492_v7, %v484_v6  ;;  %v498_v9 = vpop.permute.xlu1 %497  ;;  %v494_v10 = vsub.f32 %v484_v6, %v492_v7 }
 0x1eb   : > { %v500_v12 = vmul.f32 %v498_v9, %v460_v33 }
 0x1ec   : > { %v512_v11 = vmul.f32 2.0, %v511_v8  ;;  %v495_v15 = vmul.f32 2.0, %v494_v10 }
 0x1ed   : > { %474 = vrot.lane.b32.xlu1 %v472_v34, %s1976_s2  ;;  %547 = vrot.lane.b32.xlu0 %v430_v40, %s1985_s27  ;;  %s1990_s2 = smov 112  }
 0x1ee   : > { %v507_v13 = vpop.permute.xlu1 %506  ;;  %1797 = vset.pattern.permute.xlu1 %v1982_v30  ;;  %v596_v14 = vmul.f32 %v594_v59, %v512_v11  ;;  %v566_v20 = vmul.f32 %v564_v60, %v495_v15 }
 0x1ef   : > { %v534_v16 = vsub.f32 %v500_v12, %v507_v13  ;;  %v509_v22 = vadd.f32 %v507_v13, %v500_v12 }
 0x1f1   : > { %v535_v17 = vmul.f32 2.0, %v534_v16  ;;  %599 = vperm.xlu1 %1797, %v596_v14   ;;  %v510_v25 = vmul.f32 2.0, %v509_v22 }
 0x1f3   : > { %v632_v21 = vmul.f32 %v594_v59, %v535_v17  ;;  %v581_v28 = vmul.f32 %v579_v2, %v510_v25 }
 0x1f5   : > { %569 = vperm.xlu1 %1797, %v566_v20   ;;  %635 = vperm.xlu0 %1796, %v632_v21  }
 0x1f9   : > { %1799 = vset.pattern.permute.xlu1 %v1986_v26  ;;  %1798 = vset.pattern.permute.xlu0 %v1987_v27 }
 0x1fa   : > { %641 = vperm.xlu1 %1799, %v422_v23   ;;  %604 = vperm.xlu0 %1798, %v420_v24  }
 0x1fe   : > { %1800 = vset.pattern.permute.xlu1 %v1982_v30  ;;  %1801 = vset.pattern.permute.xlu0 %v1983_v31 }
 0x1ff   : > { %584 = vperm.xlu1 %1800, %v581_v28  }
 0x203   : > { %1802 = vset.pattern.permute.xlu1 %v1988_v4 }
 0x260   : > { %v612_v32 = vpop.permute.xlu0 %611  ;;  %v649_v33 = vpop.permute.xlu1 %648 }
 0x261   : > { %v614_v34 = vmul.f32 %v612_v32, %v545_v29  ;;  %v651_v35 = vmul.f32 %v649_v33, %v545_v29 }
 0x263   : > { %653 = vrot.lane.b32.xlu1 %v651_v35, %s1989_s9  ;;  %616 = vrot.lane.b32.xlu0 %v614_v34, %s1989_s9 }
 0x264   : > { %v661_v36 = vpop.permute.xlu0 %660  ;;  %v624_v37 = vpop.permute.xlu1 %623 }
 0x265   : > { %v663_v39 = vmul.f32 %v661_v36, %v545_v29  ;;  %v626_v40 = vmul.f32 %v624_v37, %v545_v29 }
 0x267   : > { %665 = vrot.lane.b32.xlu1 %v663_v39, %s1990_s2  ;;  %628 = vrot.lane.b32.xlu0 %v626_v40, %s1990_s2 }
 0x268   : > { %v475_v31 = vpop.permute.xlu1 %474  ;;  %v548_v45 = vpop.permute.xlu0 %547 }
 0x269   : > { %v477_v41 = vadd.f32 %v475_v31, %v2202_v38 }
 0x26b   : > { %v478_v42 = vmul.f32 2.0, %v477_v41  ;;  %559 = vperm.xlu1 %1802, %v420_v24  }
 0x26c   : > { %v600_v43 = vpop.permute.xlu1 %599 }
 0x26d   : > { %v479_v44 = vsub.f32 1.0, %v478_v42  ;;  %v602_v54 = vmul.f32 %v600_v43, %v545_v29 }
 0x26f   : > { %v550_v46 = vmul.f32 %v548_v45, %v479_v44 }
 0x270   : > { %v570_v47 = vpop.permute.xlu1 %569  ;;  %v636_v51 = vpop.permute.xlu0 %635 }
 0x271   : > { %v572_v48 = vmul.f32 %v570_v47, %v545_v29  ;;  %553 = vperm.xlu0 %1801, %v550_v46   ;;  %v638_v55 = vmul.f32 %v636_v51, %v545_v29 }
 0x273   : > { %574 = vrot.lane.b32.xlu1 %v572_v48, %s1989_s9 }
 0x275   : > { %v642_v49 = vpop.permute.xlu1 %641  ;;  %1803 = vset.pattern.permute.xlu0 %v1982_v30  ;;  %v605_v52 = vpop.permute.xlu0 %604 }
 0x276   : > { %v644_v30 = vadd.f32 %v642_v49, %v638_v55  ;;  %v607_v58 = vadd.f32 %v605_v52, %v602_v54 }
 0x27a   : > { %v585_v38 = vpop.permute.xlu1 %584 }
 0x27b   : > { %v587_v50 = vmul.f32 %v585_v38, %v545_v29 }
 0x27d   : > { %589 = vrot.lane.b32.xlu0 %v587_v50, %s1990_s2 }
 0x2d5   : > { %v654_v56 = vpop.permute.xlu1 %653  ;;  %v617_v57 = vpop.permute.xlu0 %616 }
 0x2d6   : > { %v656_v59 = vadd.f32 %v654_v56, %v644_v30  ;;  %v619_v60 = vadd.f32 %v617_v57, %v607_v58 }
 0x2d9   : > { %v666_v61 = vpop.permute.xlu1 %665  ;;  %v629_v62 = vpop.permute.xlu0 %628 }
 0x2da   : > { %v668_v63 = vadd.f32 %v666_v61, %v656_v59  ;;  %v631_v0 = vadd.f32 %v629_v62, %v619_v60 }
 0x2dc   : > { %674 = vrot.lane.b32.xlu0 %v668_v63, %s1992_s10  ;;  %670 = vrot.lane.b32.xlu1 %v631_v0, %s1993_s8 }
 0x2e6   : > { %v560_v3 = vpop.permute.xlu1 %559 }
 0x2ea   : > { %v575_v6 = vpop.permute.xlu1 %574 }
 0x2ec   : > { %v554_v1 = vpop.permute.xlu0 %553 }
 0x2ed   : > { %v556_v2 = vmul.f32 %v554_v1, %v545_v29 }
 0x2ef   : > { %v562_v5 = vadd.f32 %v560_v3, %v556_v2 }
 0x2f0   : > { %v590_v8 = vpop.permute.xlu0 %589 }
 0x2f1   : > { %v577_v7 = vadd.f32 %v575_v6, %v562_v5 }
 0x2f3   : > { %v592_v9 = vadd.f32 %v590_v8, %v577_v7 }
 0x34e   : > { %v671_v10 = vpop.permute.xlu1 %670  ;;  %v675_v11 = vpop.permute.xlu0 %674 }
 0x34f   : > { %v678_v12 = vsel %vm677_vm3, %v592_v9, %v671_v10 }
 0x350   : > { %v680_v13 = vsel %vm679_vm4, %v678_v12, %v675_v11 }
 0x351   : > { %682 = vst.msk [vmem:[%s2179_s30] sm:$0xff] %vm681_vm5, %v680_v13 }
 0x352 PF: > { %s1596_s11 = sshll.u32 %s1957_s22, 1  ;;  %s1994_s1 = smov 120   ;;  %v1996_v34 = vmov 5   ;;  %v1997_v35 = vmov 1   ;;  %v1998_v11 = vmov 0.0  }
 0x353   : > { %s694_s16 = sadd.s32 %s1953_s21, %s1596_s11  ;;  %1819 = vset.pattern.permute.xlu1 %v1996_v34  ;;  %1818 = vset.pattern.permute.xlu0 %v1997_v35 }
 0x354   : > { %s2237_s3 = sshll.u32 %s694_s16, 4 }
 0x355   : > { %s751_s15 = sadd.s32 9, %s2237_s3  ;;  %s760_s18 = sadd.s32 10, %s2237_s3 }
 0x356   : > { %s752_s17 = sld [smem:[#allocation2 + %s751_s15]]  ;;  %s699_s27 = sadd.s32 1, %s2237_s3 }
 0x357   : > { %s761_s14 = sld [smem:[#allocation2 + %s760_s18]]  ;;  %s708_s12 = sadd.s32 2, %s2237_s3 }
 0x358   : > { %s700_s9 = sld [smem:[#allocation2 + %s699_s27]]  ;;  %s725_s22 = sadd.s32 5, %s2237_s3  ;;  %v692_v14 = vld [vmem:[%s2179_s30] sm:$0xff] }
 0x359   : > { %s709_s21 = sld [smem:[#allocation2 + %s708_s12]]  ;;  %s734_s2 = sadd.s32 6, %s2237_s3 }
 0x35a   : > { %s726_s10 = sld [smem:[#allocation2 + %s725_s22]]  ;;  %s747_s8 = sadd.s32 8, %s2237_s3 }
 0x35b   : > { %s735_s11 = sld [smem:[#allocation2 + %s734_s2]]  ;;  %s721_s0 = sadd.s32 4, %s2237_s3 }
 0x35c   : > { %v753_v15 = vstv %s752_s17  ;;  %s748_s16 = sld [smem:[#allocation2 + %s747_s8]]  ;;  %s1995_s30 = smov 112  }
 0x35d   : > { %v754_v16 = vmul.f32 %v753_v15, %v692_v14  ;;  %v762_v17 = vstv %s761_s14  ;;  %s696_s15 = sld [smem:[#allocation2 + %s2237_s3]]  ;;  %s717_s27 = sadd.s32 3, %s2237_s3 }
 0x35e   : > { %v701_v18 = vstv %s700_s9  ;;  %v763_v19 = vmul.f32 %v762_v17, %v692_v14  ;;  %s722_s18 = sld [smem:[#allocation2 + %s721_s0]]  ;;  %s769_s0 = sadd.s32 11, %s2237_s3 }
 0x35f   : > { %756 = vrot.lane.b32.xlu0 %v754_v16, %s1994_s1  ;;  %v702_v20 = vmul.f32 %v701_v18, %v692_v14  ;;  %v710_v21 = vstv %s709_s21  ;;  %s770_s17 = sld [smem:[#allocation2 + %s769_s0]]  ;;  %s743_s14 = sadd.s32 7, %s2237_s3 }
 0x360   : > { %v727_v22 = vstv %s726_s10  ;;  %v711_v26 = vmul.f32 %v710_v21, %v692_v14  ;;  %s718_s12 = sld [smem:[#allocation2 + %s717_s27]]  ;;  %s2653_s3 = scalar_lea.vmem [#allocation4], %s2153_s13 }
 0x361   : > { %704 = vrot.lane.b32.xlu1 %v702_v20, %s1994_s1  ;;  %v728_v23 = vmul.f32 %v727_v22, %v692_v14  ;;  %v736_v24 = vstv %s735_s11  ;;  %s2654_s9 = smov %s2653_s3  ;;  %s1605_s13 = sshll.u32 %s1949_s20, 7 }
 0x362   : > { %v749_v25 = vstv %s748_s16  ;;  %v737_v4 = vmul.f32 %v736_v24, %v692_v14 }
 0x363   : > { %765 = vrot.lane.b32.xlu0 %v763_v19, %s1995_s30  ;;  %v750_v27 = vmul.f32 %v749_v25, %v692_v14  ;;  %v697_v28 = vstv %s696_s15 }
 0x364   : > { %v698_v29 = vmul.f32 %v697_v28, %v692_v14  ;;  %v723_v32 = vstv %s722_s18 }
 0x365   : > { %730 = vrot.lane.b32.xlu1 %v728_v23, %s1994_s1  ;;  %v724_v33 = vmul.f32 %v723_v32, %v692_v14  ;;  %s744_s1 = sld [smem:[#allocation2 + %s743_s14]]  ;;  %v771_v40 = vstv %s770_s17 }
 0x366   : > { %v719_v46 = vstv %s718_s12 }
 0x367   : > { %713 = vrot.lane.b32.xlu0 %v711_v26, %s1995_s30 }
 0x369   : > { %739 = vrot.lane.b32.xlu1 %v737_v4, %s1995_s30 }
 0x36b   : > { %v745_v38 = vstv %s744_s1 }
 0x3d1   : > { %v757_v36 = vpop.permute.xlu0 %756 }
 0x3d2   : > { %v759_v39 = vadd.f32 %v757_v36, %v750_v27 }
 0x3d3   : > { %v705_v37 = vpop.permute.xlu1 %704 }
 0x3d4   : > { %v707_v42 = vadd.f32 %v705_v37, %v698_v29  ;;  %v1999_v37 = vmov 3  }
 0x3d5   : > { %v766_v31 = vpop.permute.xlu0 %765 }
 0x3d6   : > { %v768_v41 = vadd.f32 %v766_v31, %v759_v39  ;;  %v2000_v39 = vmov 7   ;;  %v2001_v31 = vmov 0  }
 0x3d7   : > { %v731_v43 = vpop.permute.xlu1 %730 }
 0x3d8   : > { %v772_v44 = vadd.f32 %v771_v40, %v768_v41  ;;  %v733_v45 = vadd.f32 %v731_v43, %v724_v33  ;;  %v2002_v41 = vmov 4   ;;  %v2004_v43 = vmov 6  }
 0x3d9   : > { %v714_v47 = vpop.permute.xlu0 %713 }
 0x3da   : > { %v773_v48 = vmax.f32 %v772_v44, 1e-05  ;;  %v716_v49 = vadd.f32 %v714_v47, %v707_v42  ;;  %vm778_vm6 = vcmp.gt.f32.partialorder %v772_v44, 1e-05  ;;  %v2003_v42 = vmov 2  }
 0x3db   : > { %v740_v50 = vpop.permute.xlu1 %739 }
 0x3dc   : > { %v774_v51 = vmul.f32 16.0, %v773_v48  ;;  %v720_v52 = vadd.f32 %v719_v46, %v716_v49  ;;  %v742_v53 = vadd.f32 %v740_v50, %v733_v45 }
 0x3de   : > { %1882 = vrcp.f32 %v774_v51  ;;  %v746_v54 = vadd.f32 %v745_v38, %v742_v53 }
 0x3eb   : > { %v1883_v55 = vpop.eup %1882 }
 0x3ec   : > { %v776_v56 = vmul.f32 %v1883_v55, %v720_v52  ;;  %v777_v57 = vmul.f32 %v1883_v55, %v746_v54 }
 0x3ee   : > { %vm779_vm7 = vcmp.gt.f32.partialorder %v776_v56, 0.0  ;;  %vm781_vm8 = vcmp.lt.f32.partialorder %v776_v56, 1.0  ;;  %v789_v30 = vmul.f32 16.0, %v776_v56  ;;  %v791_v58 = vmul.f32 16.0, %v777_v57 }
 0x3ef   : > { %vm780_vm9 = vmand %vm778_vm6, %vm779_vm7  ;;  %vm783_vm11 = vcmp.gt.f32.partialorder %v777_v57, 0.0  ;;  %vm785_vm13 = vcmp.lt.f32.partialorder %v777_v57, 1.0 }
 0x3f0   : > { %vm782_vm10 = vmand %vm780_vm9, %vm781_vm8  ;;  %v1599_v59 = vadd.f32 -0.5, %v789_v30  ;;  %v1600_v60 = vadd.f32 -0.5, %v791_v58 }
 0x3f1   : > { %vm784_vm12 = vmand %vm782_vm10, %vm783_vm11 }
 0x3f2   : > { %v793_v61 = vfloor.f32 %v1599_v59  ;;  %vm786_vm14 = vmand %vm784_vm12, %vm785_vm13  ;;  %v794_v62 = vfloor.f32 %v1600_v60 }
 0x3f3   : > { %v1598_v12 = vsel %vm786_vm14, 1.0, %v1998_v11 }
 0x3f4   : > { %v795_v63 = vsub.f32 %v1599_v59, %v793_v61  ;;  %v1679_v0 = vtrunc.f32 %v793_v61  ;;  %v796_v1 = vsub.f32 %v1600_v60, %v794_v62  ;;  %v1681_v2 = vtrunc.f32 %v794_v62 }
 0x3f6   : > { %v1680_v3 = vcvt.f32.s32 %v1679_v0  ;;  %v813_v5 = vsub.f32 1.0, %v795_v63  ;;  %v1682_v6 = vcvt.f32.s32 %v1681_v2  ;;  %v814_v7 = vsub.f32 1.0, %v796_v1  ;;  %v1880_v2 = vld [vmem:[%s2653_s3 + $0x8] sm:$0xff]  }
 0x3f7   : > { %v830_v8 = vmul.f32 %v796_v1, %v795_v63  ;;  %1675 = vmatprep.subr.bf16.mxu1 %v1880_v2  ;;  %1663 = vmatprep.subr.bf16.mxu0 %v1880_v2 }
 0x3f8   : > { %v799_v9 = vadd.s32 1, %v1680_v3  ;;  %vm801_vm15 = vcmp.ge.s32.totalorder %v1680_v3, 0  ;;  %v825_v10 = vmul.f32 %v813_v5, %v796_v1  ;;  %v800_v13 = vadd.s32 1, %v1682_v6  ;;  %1677 = vmatpush3.bf16.xpose.msra.mxu1 %v1880_v2  ;;  %1664 = vmatpush3.bf16.xpose.msra.mxu0 %v1880_v2 }
 0x3f9   : > { %v1601_v14 = vsel %vm801_vm15, 1.0, %v1998_v11  ;;  %v815_v15 = vmul.f32 %v814_v7, %v813_v5  ;;  %vm807_vm1 = vcmp.ge.s32.totalorder %v1682_v6, 0  ;;  %v820_v16 = vmul.f32 %v814_v7, %v795_v63  ;;  %v1881_v5 = vld [vmem:[%s2654_s9] sm:$0xff]  }
 0x3fa   : > { %vm804_vm0 = vcmp.lt.s32.totalorder %v799_v9, 16  ;;  %v826_v17 = vmul.f32 %v1598_v12, %v825_v10  ;;  %vm810_vm2 = vcmp.lt.s32.totalorder %v800_v13, 16  ;;  %v831_v20 = vmul.f32 %v1598_v12, %v830_v8  ;;  %1676 = vmatprep.subr.bf16.mxu1 %v1881_v5  ;;  %1665 = vmatprep.subr.bf16.mxu0 %v1881_v5 }
 0x3fb   : > { %v1602_v18 = vsel %vm804_vm0, 1.0, %v1998_v11  ;;  %v816_v19 = vmul.f32 %v1598_v12, %v815_v15  ;;  %v821_v21 = vmul.f32 %v1598_v12, %v820_v16  ;;  %v835_v23 = vmul.u32 16, %v1682_v6 }
 0x3fc   : > { %v827_v22 = vmul.f32 %v1601_v14, %v826_v17  ;;  %v1604_v24 = vsel %vm810_vm2, 1.0, %v1998_v11  ;;  %v832_v26 = vmul.f32 %v1602_v18, %v831_v20  ;;  %v1603_v27 = vsel %vm807_vm1, 1.0, %v1998_v11 }
 0x3fd   : > { %v817_v25 = vmul.f32 %v1601_v14, %v816_v19  ;;  %v822_v28 = vmul.f32 %v1602_v18, %v821_v21  ;;  %v836_v29 = vadd.s32 %v1680_v3, %v835_v23  ;;  %v838_v16 = vlaneseq }
 0x3fe   : > { %v2259_v4 = vmul.f32 %v1604_v24, %v827_v22  ;;  %v2261_v33 = vmul.f32 %v1604_v24, %v832_v26  ;;  %v840_v20 = vstv %s1605_s13 }
 0x3ff   : > { %v818_v32 = vmul.f32 %v1603_v27, %v817_v25  ;;  %v823_v36 = vmul.f32 %v1603_v27, %v822_v28  ;;  %1105 = vperm.xlu1 %1819, %v836_v29   ;;  %901 = vperm.xlu0 %1818, %v836_v29   ;;  %v855_v40 = vadd.s32 1, %v836_v29  ;;  %v870_v44 = vadd.s32 16, %v836_v29 }
 0x400   : > { %v2299_v48 = vpack.c.bf16 %v2259_v4, %v2259_v4  ;;  %v2315_v49 = vpack.c.bf16 %v2261_v33, %v2261_v33  ;;  %1678 = vmatpush3.bf16.xpose.msra.mxu1 %v1881_v5  ;;  %1666 = vmatpush3.bf16.xpose.msra.mxu0 %v1881_v5  ;;  %v839_v18 = vand.u32 127, %v838_v16 }
 0x401   : > { %v885_v45 = vadd.s32 1, %v870_v44  ;;  %v2281_v46 = vpack.c.bf16 %v818_v32, %v818_v32  ;;  %v2286_v47 = vpack.c.bf16 %v823_v36, %v823_v36 }
 0x402   : > { %v2430_v22 = vadd.s32 %v840_v20, %v839_v18 }
 0x403   : > { %1820 = vset.pattern.permute.xlu1 %v1999_v37  ;;  %1821 = vset.pattern.permute.xlu0 %v2000_v39 }
 0x404   : > { %1003 = vperm.xlu1 %1820, %v836_v29   ;;  %1207 = vperm.xlu0 %1821, %v836_v29  }
 0x408   : > { %1822 = vset.pattern.permute.xlu1 %v2001_v31  ;;  %1827 = vset.pattern.permute.xlu0 %v1996_v34 }
 0x409   : > { %843 = vperm.xlu1 %1822, %v836_v29   ;;  %1117 = vperm.xlu0 %1827, %v855_v40  }
 0x40d   : > { %1823 = vset.pattern.permute.xlu1 %v2002_v41  ;;  %1830 = vset.pattern.permute.xlu0 %v2001_v31 }
 0x40e   : > { %1054 = vperm.xlu1 %1823, %v836_v29   ;;  %857 = vperm.xlu0 %1830, %v855_v40  }
 0x412   : > { %1824 = vset.pattern.permute.xlu1 %v2003_v42  ;;  %1832 = vset.pattern.permute.xlu0 %v2002_v41 }
 0x413   : > { %952 = vperm.xlu1 %1824, %v836_v29   ;;  %1066 = vperm.xlu0 %1832, %v855_v40  }
 0x417   : > { %1825 = vset.pattern.permute.xlu1 %v2004_v43  ;;  %1834 = vset.pattern.permute.xlu0 %v2003_v42 }
 0x418   : > { %1156 = vperm.xlu1 %1825, %v836_v29   ;;  %964 = vperm.xlu0 %1834, %v855_v40  }
 0x41c   : > { %1826 = vset.pattern.permute.xlu1 %v1997_v35  ;;  %1836 = vset.pattern.permute.xlu0 %v2004_v43 }
 0x41d   : > { %1168 = vperm.xlu0 %1836, %v855_v40   ;;  %913 = vperm.xlu1 %1826, %v855_v40  }
 0x421   : > { %1839 = vset.pattern.permute.xlu0 %v2002_v41  ;;  %1828 = vset.pattern.permute.xlu1 %v1999_v37 }
 0x422   : > { %1079 = vperm.xlu0 %1839, %v870_v44   ;;  %1015 = vperm.xlu1 %1828, %v855_v40  }
 0x426   : > { %1843 = vset.pattern.permute.xlu0 %v1996_v34  ;;  %1829 = vset.pattern.permute.xlu1 %v2000_v39 }
 0x427   : > { %1143 = vperm.xlu0 %1843, %v885_v45   ;;  %1219 = vperm.xlu1 %1829, %v855_v40  }
 0x42b   : > { %1847 = vset.pattern.permute.xlu0 %v2002_v41  ;;  %1831 = vset.pattern.permute.xlu1 %v1997_v35 }
 0x42c   : > { %1092 = vperm.xlu0 %1847, %v885_v45   ;;  %926 = vperm.xlu1 %1831, %v870_v44  }
 0x430   : > { %1850 = vset.pattern.permute.xlu0 %v1997_v35  ;;  %1833 = vset.pattern.permute.xlu1 %v1996_v34 }
 0x431   : > { %1130 = vperm.xlu1 %1833, %v870_v44   ;;  %908 = vperm.xlu0 %1850, %v2281_v46  }
 0x435   : > { %1835 = vset.pattern.permute.xlu1 %v1999_v37  ;;  %1854 = vset.pattern.permute.xlu0 %v1999_v37 }
 0x436   : > { %1028 = vperm.xlu1 %1835, %v870_v44   ;;  %1022 = vperm.xlu0 %1854, %v2286_v47  }
 0x43a   : > { %1837 = vset.pattern.permute.xlu1 %v2000_v39  ;;  %1855 = vset.pattern.permute.xlu0 %v2000_v39 }
 0x43b   : > { %1232 = vperm.xlu1 %1837, %v870_v44   ;;  %1214 = vperm.xlu0 %1855, %v2281_v46  }
 0x43f   : > { %1838 = vset.pattern.permute.xlu1 %v2001_v31  ;;  %1857 = vset.pattern.permute.xlu0 %v2001_v31 }
 0x440   : > { %872 = vperm.xlu1 %1838, %v870_v44   ;;  %851 = vperm.xlu0 %1857, %v2281_v46  }
 0x444   : > { %1840 = vset.pattern.permute.xlu1 %v2003_v42  ;;  %1859 = vset.pattern.permute.xlu0 %v1997_v35 }
 0x445   : > { %977 = vperm.xlu1 %1840, %v870_v44   ;;  %933 = vperm.xlu0 %1859, %v2299_v48  }
 0x449   : > { %1841 = vset.pattern.permute.xlu1 %v2004_v43  ;;  %1863 = vset.pattern.permute.xlu0 %v2003_v42 }
 0x44a   : > { %1181 = vperm.xlu1 %1841, %v870_v44   ;;  %971 = vperm.xlu0 %1863, %v2286_v47  }
 0x44e   : > { %1842 = vset.pattern.permute.xlu1 %v1997_v35  ;;  %1866 = vset.pattern.permute.xlu0 %v2000_v39 }
 0x44f   : > { %939 = vperm.xlu1 %1842, %v885_v45   ;;  %1239 = vperm.xlu0 %1866, %v2299_v48  }
 0x453   : > { %1844 = vset.pattern.permute.xlu1 %v1999_v37  ;;  %1869 = vset.pattern.permute.xlu0 %v2002_v41 }
 0x454   : > { %1041 = vperm.xlu1 %1844, %v885_v45   ;;  %1086 = vperm.xlu0 %1869, %v2299_v48  }
 0x458   : > { %1845 = vset.pattern.permute.xlu1 %v2000_v39  ;;  %1872 = vset.pattern.permute.xlu0 %v1999_v37 }
 0x459   : > { %1245 = vperm.xlu1 %1845, %v885_v45   ;;  %1048 = vperm.xlu0 %1872, %v2315_v49  }
 0x45d   : > { %1846 = vset.pattern.permute.xlu1 %v2001_v31  ;;  %1875 = vset.pattern.permute.xlu0 %v2001_v31 }
 0x45e   : > { %887 = vperm.xlu1 %1846, %v885_v45   ;;  %895 = vperm.xlu0 %1875, %v2315_v49  }
 0x462   : > { %1848 = vset.pattern.permute.xlu1 %v2003_v42  ;;  %1876 = vset.pattern.permute.xlu0 %v2004_v43 }
 0x463   : > { %990 = vperm.xlu1 %1848, %v885_v45   ;;  %1163 = vperm.xlu0 %1876, %v2281_v46  }
 0x467   : > { %1849 = vset.pattern.permute.xlu1 %v2004_v43  ;;  %1201 = vperm.xlu0 %1876, %v2315_v49  }
 0x468   : > { %1194 = vperm.xlu1 %1849, %v885_v45  }
 0x46b   : > { %1879 = vset.pattern.permute.xlu0 %v2000_v39 }
 0x46c   : > { %1851 = vset.pattern.permute.xlu1 %v1997_v35 }
 0x46d   : > { %920 = vperm.xlu1 %1851, %v2286_v47  }
 0x471   : > { %1852 = vset.pattern.permute.xlu1 %v1996_v34 }
 0x472   : > { %1112 = vperm.xlu1 %1852, %v2281_v46  }
 0x476   : > { %1124 = vperm.xlu1 %1852, %v2286_v47  }
 0x47a   : > { %v2334_v38 = vpop.permute.xlu1 %1105  ;;  %1853 = vset.pattern.permute.xlu1 %v1999_v37  ;;  %v2357_v55 = vpop.permute.xlu0 %901 }
 0x47b   : > { %1010 = vperm.xlu1 %1853, %v2281_v46   ;;  %vm903_vm3 = vcmp.eq.s32.totalorder %v2430_v22, %v2357_v55  ;;  %vm1107_vm6 = vcmp.eq.s32.totalorder %v2430_v22, %v2334_v38 }
 0x47c   : > { %v1610_v26 = vsel %vm903_vm3, 1.0, %v1998_v11  ;;  %v1626_v36 = vsel %vm1107_vm6, 1.0, %v1998_v11 }
 0x47d   : > { %v906_v4 = vpack.c.bf16 %v1610_v26, %v1610_v26 }
 0x47f   : > { %v2338_v50 = vpop.permute.xlu1 %1003  ;;  %1856 = vset.pattern.permute.xlu1 %v2000_v39  ;;  %v2363_v57 = vpop.permute.xlu0 %1207 }
 0x480   : > { %1226 = vperm.xlu1 %1856, %v2286_v47   ;;  %vm1005_vm8 = vcmp.eq.s32.totalorder %v2430_v22, %v2338_v50  ;;  %vm1209_vm10 = vcmp.eq.s32.totalorder %v2430_v22, %v2363_v57 }
 0x481   : > { %v1634_v2 = vsel %vm1209_vm10, 1.0, %v1998_v11 }
 0x482   : > { %v1212_v18 = vpack.c.bf16 %v1634_v2, %v1634_v2 }
 0x484   : > { %v2342_v51 = vpop.permute.xlu1 %843  ;;  %1858 = vset.pattern.permute.xlu1 %v2001_v31  ;;  %v2369_v58 = vpop.permute.xlu0 %1117 }
 0x485   : > { %865 = vperm.xlu1 %1858, %v2286_v47   ;;  %vm1119_vm7 = vcmp.eq.s32.totalorder %v2430_v22, %v2369_v58 }
 0x489   : > { %v2346_v52 = vpop.permute.xlu1 %1054  ;;  %1860 = vset.pattern.permute.xlu1 %v2002_v41  ;;  %v2375_v60 = vpop.permute.xlu0 %857 }
 0x48a   : > { %1061 = vperm.xlu1 %1860, %v2281_v46   ;;  %vm1056_vm13 = vcmp.eq.s32.totalorder %v2430_v22, %v2346_v52 }
 0x48e   : > { %v2350_v53 = vpop.permute.xlu1 %952  ;;  %1073 = vperm.xlu1 %1860, %v2286_v47   ;;  %v2380_v62 = vpop.permute.xlu0 %1066 }
 0x48f   : > { %vm1068_vm14 = vcmp.eq.s32.totalorder %v2430_v22, %v2380_v62  ;;  %vm954_vm1 = vcmp.eq.s32.totalorder %v2430_v22, %v2350_v53 }
 0x492   : > { %1861 = vset.pattern.permute.xlu1 %v1996_v34 }
 0x493   : > { %v2354_v54 = vpop.permute.xlu1 %1156  ;;  %1137 = vperm.xlu1 %1861, %v2299_v48   ;;  %v2389_v1 = vpop.permute.xlu0 %964 }
 0x494   : > { %vm966_vm2 = vcmp.eq.s32.totalorder %v2430_v22, %v2389_v1 }
 0x497   : > { %1862 = vset.pattern.permute.xlu1 %v2003_v42 }
 0x498   : > { %v2360_v56 = vpop.permute.xlu1 %913  ;;  %959 = vperm.xlu1 %1862, %v2281_v46   ;;  %v2397_v3 = vpop.permute.xlu0 %1168 }
 0x499   : > { %vm915_vm4 = vcmp.eq.s32.totalorder %v2430_v22, %v2360_v56  ;;  %vm1170_vm6 = vcmp.eq.s32.totalorder %v2430_v22, %v2397_v3 }
 0x49a   : > { %v1611_v27 = vsel %vm915_vm4, 1.0, %v1998_v11 }
 0x49b   : > { %v918_v29 = vpack.c.bf16 %v1611_v27, %v1611_v27 }
 0x49c   : > { %1864 = vset.pattern.permute.xlu1 %v1999_v37 }
 0x49d   : > { %v2366_v30 = vpop.permute.xlu1 %1015  ;;  %1035 = vperm.xlu1 %1864, %v2299_v48   ;;  %v2405_v6 = vpop.permute.xlu0 %1079 }
 0x49e   : > { %vm1017_vm9 = vcmp.eq.s32.totalorder %v2430_v22, %v2366_v30  ;;  %vm1081_vm15 = vcmp.eq.s32.totalorder %v2430_v22, %v2405_v6 }
 0x49f   : > { %v1619_v38 = vsel %vm1017_vm9, 1.0, %v1998_v11 }
 0x4a0   : > { %v1020_v50 = vpack.c.bf16 %v1619_v38, %v1619_v38  ;;  %v1615_v38 = vsel %vm966_vm2, 1.0, %v1998_v11 }
 0x4a1   : > { %1865 = vset.pattern.permute.xlu1 %v2004_v43 }
 0x4a2   : > { %v2372_v59 = vpop.permute.xlu1 %1219  ;;  %1175 = vperm.xlu1 %1865, %v2286_v47   ;;  %v2411_v8 = vpop.permute.xlu0 %1143 }
 0x4a3   : > { %vm1221_vm11 = vcmp.eq.s32.totalorder %v2430_v22, %v2372_v59 }
 0x4a4   : > { %v1635_v5 = vsel %vm1221_vm11, 1.0, %v1998_v11 }
 0x4a5   : > { %v1224_v20 = vpack.c.bf16 %v1635_v5, %v1635_v5 }
 0x4a6   : > { %1867 = vset.pattern.permute.xlu1 %v2001_v31 }
 0x4a7   : > { %v927_v61 = vpop.permute.xlu1 %926  ;;  %880 = vperm.xlu1 %1867, %v2299_v48   ;;  %v2418_v10 = vpop.permute.xlu0 %1092 }
 0x4a8   : > { %vm928_vm5 = vcmp.eq.s32.totalorder %v2430_v22, %v927_v61  ;;  %vm1094_vm2 = vcmp.eq.s32.totalorder %v2430_v22, %v2418_v10 }
 0x4a9   : > { %v1612_v28 = vsel %vm928_vm5, 1.0, %v1998_v11  ;;  %vm1158_vm5 = vcmp.eq.s32.totalorder %v2430_v22, %v2354_v54 }
 0x4aa   : > { %v931_v37 = vpack.c.bf16 %v1612_v28, %v1612_v28 }
 0x4ab   : > { %1868 = vset.pattern.permute.xlu1 %v1997_v35 }
 0x4ac   : > { %v2382_v63 = vpop.permute.xlu1 %1130  ;;  %946 = vperm.xlu1 %1868, %v2315_v49   ;;  %v909_v14 = vpop.permute.xlu0 %908 }
 0x4ad   : > { %vm1132_vm0 = vcmp.eq.s32.totalorder %v2430_v22, %v2382_v63 }
 0x4ae   : > { %v1628_v62 = vsel %vm1132_vm0, 1.0, %v1998_v11  ;;  %vm1145_vm0 = vcmp.eq.s32.totalorder %v2430_v22, %v2411_v8 }
 0x4b0   : > { %1870 = vset.pattern.permute.xlu1 %v1996_v34 }
 0x4b1   : > { %v2386_v0 = vpop.permute.xlu1 %1028  ;;  %1150 = vperm.xlu1 %1870, %v2315_v49   ;;  %v1023_v17 = vpop.permute.xlu0 %1022 }
 0x4b2   : > { %vm1030_vm3 = vcmp.eq.s32.totalorder %v2430_v22, %v2386_v0 }
 0x4b3   : > { %v1620_v2 = vsel %vm1030_vm3, 1.0, %v1998_v11 }
 0x4b5   : > { %1871 = vset.pattern.permute.xlu1 %v2003_v42 }
 0x4b6   : > { %v2394_v35 = vpop.permute.xlu1 %1232  ;;  %984 = vperm.xlu1 %1871, %v2299_v48   ;;  %v1215_v21 = vpop.permute.xlu0 %1214 }
 0x4b7   : > { %vm1234_vm12 = vcmp.eq.s32.totalorder %v2430_v22, %v2394_v35  ;;  %v1217_v35 = vmul.bf16 %v1215_v21, %v1212_v18  ;;  %v1623_v21 = vsel %vm1068_vm14, 1.0, %v1998_v11 }
 0x4b8   : > { %v1636_v57 = vsel %vm1234_vm12, 1.0, %v1998_v11 }
 0x4b9   : > { %v1237_v28 = vpack.c.bf16 %v1636_v57, %v1636_v57 }
 0x4ba   : > { %1873 = vset.pattern.permute.xlu1 %v2004_v43  ;;  %v1627_v43 = vsel %vm1119_vm7, 1.0, %v1998_v11  ;;  %vm859_vm7 = vcmp.eq.s32.totalorder %v2430_v22, %v2375_v60 }
 0x4bb   : > { %v2400_v34 = vpop.permute.xlu1 %872  ;;  %1188 = vperm.xlu1 %1873, %v2299_v48   ;;  %v2438_v24 = vpop.permute.xlu0 %851  ;;  %v1122_v47 = vpack.c.bf16 %v1627_v43, %v1627_v43 }
 0x4bc   : > { %vm874_vm9 = vcmp.eq.s32.totalorder %v2430_v22, %v2400_v34 }
 0x4bf   : > { %1874 = vset.pattern.permute.xlu1 %v2000_v39  ;;  %v911_v39 = vmul.bf16 %v909_v14, %v906_v4  ;;  %v2471_v14 = vmul.bf16 %v1023_v17, %v1020_v50  ;;  %v969_v50 = vpack.c.bf16 %v1615_v38, %v1615_v38 }
 0x4c0   : > { %v2408_v7 = vpop.permute.xlu1 %977  ;;  %1252 = vperm.xlu1 %1874, %v2315_v49   ;;  %v934_v32 = vpop.permute.xlu0 %933 }
 0x4c1   : > { %v936_v31 = vmul.bf16 %v934_v32, %v931_v37  ;;  %vm979_vm12 = vcmp.eq.s32.totalorder %v2430_v22, %v2408_v7 }
 0x4c2   : > { %v1616_v38 = vsel %vm979_vm12, 1.0, %v1998_v11 }
 0x4c4   : > { %1877 = vset.pattern.permute.xlu1 %v2002_v41 }
 0x4c5   : > { %v2414_v9 = vpop.permute.xlu1 %1181  ;;  %1099 = vperm.xlu1 %1877, %v2315_v49   ;;  %v972_v61 = vpop.permute.xlu0 %971 }
 0x4c6   : > { %v2509_v5 = vmul.bf16 %v972_v61, %v969_v50  ;;  %vm1183_vm14 = vcmp.eq.s32.totalorder %v2430_v22, %v2414_v9 }
 0x4c9   : > { %1878 = vset.pattern.permute.xlu1 %v2003_v42  ;;  %v1110_v42 = vpack.c.bf16 %v1626_v36, %v1626_v36  ;;  %v1622_v36 = vsel %vm1056_vm13, 1.0, %v1998_v11  ;;  %vm1265_vm13 = vcmask 1043456  }
 0x4ca   : > { %v2420_v12 = vpop.permute.xlu1 %939  ;;  %997 = vperm.xlu1 %1878, %v2315_v49   ;;  %v1618_v49 = vsel %vm1005_vm8, 1.0, %v1998_v11  ;;  %v1240_v26 = vpop.permute.xlu0 %1239  ;;  %vm845_vm8 = vcmp.eq.s32.totalorder %v2430_v22, %v2342_v51 }
 0x4cb   : > { %v1008_v58 = vpack.c.bf16 %v1618_v49, %v1618_v49  ;;  %v1614_v49 = vsel %vm954_vm1, 1.0, %v1998_v11  ;;  %v1606_v51 = vsel %vm845_vm8, 1.0, %v1998_v11  ;;  %vm941_vm10 = vcmp.eq.s32.totalorder %v2430_v22, %v2420_v12 }
 0x4cc   : > { %v957_v1 = vpack.c.bf16 %v1614_v49, %v1614_v49 }
 0x4cf   : > { %v2423_v13 = vpop.permute.xlu1 %1041 }
 0x4d0   : > { %vm1043_vm4 = vcmp.eq.s32.totalorder %v2430_v22, %v2423_v13  ;;  %v1033_v13 = vpack.c.bf16 %v1620_v2, %v1620_v2 }
 0x4d1   : > { %v1621_v57 = vsel %vm1043_vm4, 1.0, %v1998_v11  ;;  %vm1365_vm4 = vcmask 261120  }
 0x4d4   : > { %v2425_v15 = vpop.permute.xlu1 %1245 }
 0x4d5   : > { %vm1247_vm1 = vcmp.eq.s32.totalorder %v2430_v22, %v2425_v15 }
 0x4d9   : > { %v2428_v19 = vpop.permute.xlu1 %887 }
 0x4da   : > { %vm889_vm11 = vcmp.eq.s32.totalorder %v2430_v22, %v2428_v19 }
 0x4de   : > { %v2432_v23 = vpop.permute.xlu1 %990 }
 0x4df   : > { %vm992_vm3 = vcmp.eq.s32.totalorder %v2430_v22, %v2432_v23 }
 0x4e0   : > { %v1617_v10 = vsel %vm992_vm3, 1.0, %v1998_v11 }
 0x4e3   : > { %v2441_v25 = vpop.permute.xlu1 %1194 }
 0x4e8   : > { %v921_v33 = vpop.permute.xlu1 %920 }
 0x4e9   : > { %v923_v40 = vmul.bf16 %v921_v33, %v918_v29  ;;  %v1242_v29 = vmul.bf16 %v1240_v26, %v1237_v28  ;;  %v1630_v26 = vsel %vm1158_vm5, 1.0, %v1998_v11  ;;  %v1607_v28 = vsel %vm859_vm7, 1.0, %v1998_v11 }
 0x4eb   : > { %v924_v41 = vadd.bf16 %v923_v40, %v911_v39  ;;  %v1624_v39 = vsel %vm1081_vm15, 1.0, %v1998_v11  ;;  %v1059_v40 = vpack.c.bf16 %v1622_v36, %v1622_v36  ;;  %vm1196_vm15 = vcmp.eq.s32.totalorder %v2430_v22, %v2441_v25 }
 0x4ed   : > { %v1113_v44 = vpop.permute.xlu1 %1112  ;;  %v2452_v45 = vadd.bf16 %v936_v31, %v924_v41  ;;  %v1071_v31 = vpack.c.bf16 %v1623_v21, %v1623_v21  ;;  %v1087_v41 = vpop.permute.xlu0 %1086 }
 0x4ee   : > { %v2454_v46 = vmul.bf16 %v1113_v44, %v1110_v42  ;;  %v1084_v42 = vpack.c.bf16 %v1624_v39, %v1624_v39 }
 0x4f0   : > { %v1089_v6 = vmul.bf16 %v1087_v41, %v1084_v42  ;;  %v1609_v42 = vsel %vm889_vm11, 1.0, %v1998_v11 }
 0x4f1   : > { %v1125_v48 = vpop.permute.xlu1 %1124 }
 0x4f2   : > { %v1127_v55 = vmul.bf16 %v1125_v48, %v1122_v47  ;;  %v1135_v47 = vpack.c.bf16 %v1628_v62, %v1628_v62 }
 0x4f4   : > { %v1128_v56 = vadd.bf16 %v1127_v55, %v2454_v46  ;;  %v1049_v55 = vpop.permute.xlu0 %1048 }
 0x4f6   : > { %v1011_v30 = vpop.permute.xlu1 %1010 }
 0x4f7   : > { %v2473_v16 = vmul.bf16 %v1011_v30, %v1008_v58 }
 0x4f9   : > { %v1026_v59 = vadd.bf16 %v2471_v14, %v2473_v16 }
 0x4fb   : > { %v1227_v27 = vpop.permute.xlu1 %1226 }
 0x4fc   : > { %v1229_v4 = vmul.bf16 %v1227_v27, %v1224_v20  ;;  %v896_v20 = vpop.permute.xlu0 %895  ;;  %v1631_v27 = vsel %vm1170_vm6, 1.0, %v1998_v11 }
 0x4fe   : > { %v1230_v32 = vadd.bf16 %v1229_v4, %v1217_v35  ;;  %v1161_v4 = vpack.c.bf16 %v1630_v26, %v1630_v26 }
 0x500   : > { %v2478_v33 = vpop.permute.xlu1 %865  ;;  %v2480_v17 = vadd.bf16 %v1242_v29, %v1230_v32  ;;  %v1164_v35 = vpop.permute.xlu0 %1163  ;;  %v1173_v29 = vpack.c.bf16 %v1631_v27, %v1631_v27  ;;  %v862_v32 = vpack.c.bf16 %v1607_v28, %v1607_v28 }
 0x501   : > { %v1166_v34 = vmul.bf16 %v1164_v35, %v1161_v4 }
 0x505   : > { %v1062_v37 = vpop.permute.xlu1 %1061 }
 0x506   : > { %v1064_v43 = vmul.bf16 %v1062_v37, %v1059_v40  ;;  %v1608_v37 = vsel %vm874_vm9, 1.0, %v1998_v11  ;;  %v848_v40 = vpack.c.bf16 %v1606_v51, %v1606_v51 }
 0x507   : > { %v877_v16 = vpack.c.bf16 %v1608_v37, %v1608_v37 }
 0x509   : > { %v1074_v52 = vpop.permute.xlu1 %1073 }
 0x50a   : > { %v1076_v44 = vmul.bf16 %v1074_v52, %v1071_v31  ;;  %v868_v31 = vmul.bf16 %v2478_v33, %v862_v32  ;;  %v1613_v52 = vsel %vm941_vm10, 1.0, %v1998_v11  ;;  %v892_v33 = vpack.c.bf16 %v1609_v42, %v1609_v42  ;;  %v1363_v42 = vld [vmem:[%s2173_s6] sm:$0xff] }
 0x50c   : > { %v1077_v46 = vadd.bf16 %v1076_v44, %v1064_v43  ;;  %v898_v12 = vmul.bf16 %v896_v20, %v892_v33  ;;  %v1202_v20 = vpop.permute.xlu0 %1201 }
 0x50e   : > { %v1138_v48 = vpop.permute.xlu1 %1137  ;;  %v2498_v63 = vadd.bf16 %v1089_v6, %v1077_v46  ;;  %v944_v6 = vpack.c.bf16 %v1613_v52, %v1613_v52  ;;  %v1652_v52 = vld [vmem:[%s2173_s6 + $0x38] sm:$0xff] }
 0x50f   : > { %v1140_v58 = vmul.bf16 %v1138_v48, %v1135_v47 }
 0x511   : > { %v2506_v53 = vadd.bf16 %v1140_v58, %v1128_v56  ;;  %v1046_v56 = vpack.c.bf16 %v1621_v57, %v1621_v57  ;;  %v982_v58 = vpack.c.bf16 %v1616_v38, %v1616_v38  ;;  %v1637_v57 = vsel %vm1247_vm1, 1.0, %v1998_v11 }
 0x512   : > { %v1250_v8 = vpack.c.bf16 %v1637_v57, %v1637_v57 }
 0x513   : > { %v960_v30 = vpop.permute.xlu1 %959  ;;  %v2529_v3 = vmul.bf16 %v1049_v55, %v1046_v56 }
 0x514   : > { %v2512_v18 = vmul.bf16 %v960_v30, %v957_v1  ;;  %v1632_v1 = vsel %vm1183_vm14, 1.0, %v1998_v11 }
 0x515   : > { %v1186_v2 = vpack.c.bf16 %v1632_v1, %v1632_v1 }
 0x516   : > { %v975_v0 = vadd.bf16 %v2509_v5, %v2512_v18  ;;  %v1629_v5 = vsel %vm1145_vm0, 1.0, %v1998_v11 }
 0x518   : > { %v1036_v61 = vpop.permute.xlu1 %1035 }
 0x519   : > { %v1038_v54 = vmul.bf16 %v1036_v61, %v1033_v13  ;;  %v1148_v13 = vpack.c.bf16 %v1629_v5, %v1629_v5 }
 0x51b   : > { %v2534_v60 = vadd.bf16 %v1038_v54, %v1026_v59  ;;  %v854_v59 = vmul.bf16 %v2438_v24, %v848_v40 }
 0x51d   : > { %v1052_v36 = vadd.bf16 %v2529_v3, %v2534_v60  ;;  %v1176_v21 = vpop.permute.xlu1 %1175  ;;  %v869_v62 = vadd.bf16 %v868_v31, %v854_v59 }
 0x51e   : > { %v1178_v39 = vmul.bf16 %v1176_v21, %v1173_v29 }
 0x520   : > { %v1179_v14 = vadd.bf16 %v1178_v39, %v1166_v34  ;;  %v995_v39 = vpack.c.bf16 %v1617_v10, %v1617_v10 }
 0x522   : > { %v881_v41 = vpop.permute.xlu1 %880 }
 0x523   : > { %v883_v43 = vmul.bf16 %v881_v41, %v877_v16  ;;  %v1642_v41 = vld [vmem:[%s2173_s6 + $0x10] sm:$0xff] }
 0x525   : > { %v884_v44 = vadd.bf16 %v883_v43, %v869_v62  ;;  %v1648_v62 = vld [vmem:[%s2173_s6 + $0x28] sm:$0xff] }
 0x527   : > { %v947_v46 = vpop.permute.xlu1 %946  ;;  %v899_v49 = vadd.bf16 %v898_v12, %v884_v44 }
 0x528   : > { %v949_v47 = vmul.bf16 %v947_v46, %v944_v6  ;;  %v1644_v46 = vld [vmem:[%s2173_s6 + $0x18] sm:$0xff] }
 0x52a   : > { %v950_v19 = vadd.bf16 %v949_v47, %v2452_v45  ;;  %v1633_v45 = vsel %vm1196_vm15, 1.0, %v1998_v11 }
 0x52b   : > { %v1199_v9 = vpack.c.bf16 %v1633_v45, %v1633_v45 }
 0x52c   : > { %v1258_v24 = vrot.slane %v950_v19, 4  ;;  %v1151_v48 = vpop.permute.xlu1 %1150 }
 0x52d   : > { %v1204_v56 = vmul.bf16 %v1202_v20, %v1199_v9  ;;  %v1153_v26 = vmul.bf16 %v1151_v48, %v1148_v13 }
 0x52e   : > { %v1268_v55 = vsel %vm1265_vm13, %v899_v49, %v1258_v24  ;;  %v1640_v24 = vld [vmem:[%s2173_s6 + $0x8] sm:$0xff] }
 0x52f   : > { %1667 = vmatprep.mubr.bf16.mxu0 %v1268_v55  ;;  %v1154_v51 = vadd.bf16 %v1153_v26, %v2506_v53 }
 0x531   : > { %v985_v7 = vpop.permute.xlu1 %984  ;;  %v1262_v37 = vrot.slane %v1154_v51, 4 }
 0x532   : > { %v987_v50 = vmul.bf16 %v985_v7, %v982_v58 }
 0x534   : > { %v988_v30 = vadd.bf16 %v987_v50, %v975_v0  ;;  %v1625_v0 = vsel %vm1094_vm2, 1.0, %v1998_v11  ;;  %v1260_v11 = vrot.slane %v1052_v36, 4 }
 0x535   : > { %v1097_v35 = vpack.c.bf16 %v1625_v0, %v1625_v0 }
 0x536   : > { %v1189_v25 = vpop.permute.xlu1 %1188 }
 0x537   : > { %v1191_v18 = vmul.bf16 %v1189_v25, %v1186_v2 }
 0x539   : > { %v1192_v61 = vadd.bf16 %v1191_v18, %v1179_v14  ;;  %v1646_v14 = vld [vmem:[%s2173_s6 + $0x20] sm:$0xff] }
 0x53b   : > { %v1205_v27 = vadd.bf16 %v1204_v56, %v1192_v61  ;;  %v1253_v15 = vpop.permute.xlu1 %1252 }
 0x53c   : > { %v1255_v54 = vmul.bf16 %v1253_v15, %v1250_v8 }
 0x53e   : > { %v1256_v28 = vadd.bf16 %v1255_v54, %v2480_v17 }
 0x540   : > { %v1264_v4 = vrot.slane %v1256_v28, 4  ;;  %v1100_v29 = vpop.permute.xlu1 %1099 }
 0x541   : > { %v1102_v32 = vmul.bf16 %v1100_v29, %v1097_v35 }
 0x542   : > { %v1280_v21 = vsel %vm1265_vm13, %v1205_v27, %v1264_v4 }
 0x543   : > { %v1103_v34 = vadd.bf16 %v1102_v32, %v2498_v63  ;;  %v1650_v63 = vld [vmem:[%s2173_s6 + $0x30] sm:$0xff] }
 0x545   : > { %v998_v22 = vpop.permute.xlu1 %997  ;;  %v1276_v23 = vsel %vm1265_vm13, %v1103_v34, %v1262_v37 }
 0x546   : > { %v1000_v17 = vmul.bf16 %v998_v22, %v995_v39  ;;  %1671 = vmatprep.mubr.bf16.mxu1 %v1276_v23 }
 0x547   : > { %1672 = vmatmul.mubr.bf16.vlgmr.msra.gmra.mxu1 %v1280_v21 }
 0x548   : > { %v1001_v53 = vadd.bf16 %v1000_v17, %v988_v30 }
 0x54a   : > { %v1272_v40 = vsel %vm1265_vm13, %v1001_v53, %v1260_v11 }
 0x54b   : > { %1668 = vmatmul.mubr.bf16.vlgmr.msra.gmra.mxu0 %v1272_v40 }
 0x607   : > { %v1673_v31 = vpop.f32.mrf.mxu1 }
 0x608   : > { %v1389_v16 = vadd.f32 %v1673_v31, %v1650_v63 }
 0x609   : > { %v1348_v59 = vpop.f32.mrf.mxu1 }
 0x60a   : > { %1651 = vst.msk [vmem:[%s2173_s6 + $0x30] sm:$0xff] %vm1365_vm4, %v1389_v16  ;;  %v1381_v3 = vadd.f32 %v1646_v14, %v1348_v59 }
 0x60b   : > { %v1669_v60 = vpop.f32.mrf.mxu0  ;;  %v1674_v36 = vpop.f32.mrf.mxu1 }
 0x60c   : > { %1647 = vst.msk [vmem:[%s2173_s6 + $0x20] sm:$0xff] %vm1365_vm4, %v1381_v3  ;;  %v1373_v43 = vadd.f32 %v1669_v60, %v1642_v41  ;;  %v1393_v44 = vadd.f32 %v1674_v36, %v1652_v52 }
 0x60d   : > { %v1332_v6 = vpop.f32.mrf.mxu0  ;;  %v1351_v33 = vpop.f32.mrf.mxu1 }
 0x60e   : > { %1643 = vst.msk [vmem:[%s2173_s6 + $0x10] sm:$0xff] %vm1365_vm4, %v1373_v43  ;;  %1653 = vst.msk [vmem:[%s2173_s6 + $0x38] sm:$0xff] %vm1365_vm4, %v1393_v44  ;;  %v1364_v47 = vadd.f32 %v1363_v42, %v1332_v6  ;;  %v1385_v12 = vadd.f32 %v1648_v62, %v1351_v33 }
 0x60f   : > { %v1670_v19 = vpop.f32.mrf.mxu0 }
 0x610   : > { %1366 = vst.msk [vmem:[%s2173_s6] sm:$0xff] %vm1365_vm4, %v1364_v47  ;;  %1649 = vst.msk [vmem:[%s2173_s6 + $0x28] sm:$0xff] %vm1365_vm4, %v1385_v12  ;;  %v1377_v48 = vadd.f32 %v1670_v19, %v1644_v46 }
 0x611   : > { %v1335_v49 = vpop.f32.mrf.mxu0 }
 0x612   : > { %1645 = vst.msk [vmem:[%s2173_s6 + $0x18] sm:$0xff] %vm1365_vm4, %v1377_v48  ;;  %v1369_v38 = vadd.f32 %v1640_v24, %v1335_v49 }
 0x614   : > { %1641 = vst.msk [vmem:[%s2173_s6 + $0x8] sm:$0xff] %vm1365_vm4, %v1369_v38 }
 0x615 PF: > { %s17_s26 = sadd.s32 1, %s1973_s26   ;;  %s2655_s2 = sld [smem:[#allocation6_spill]] }
 0x616   : > { %p14_p9 = scmp.ge.s32.totalorder %s17_s26, 10   ;;  %s2656_s18 = smov %s1945_s19 }
 0x617   : > { %s2657_s19 = smov %s2134_s7  ;;  %s2658_s20 = smov %s1961_s23 }
 0x618   : > { %s2659_s21 = smov %s1965_s24  ;;  %s2660_s22 = smov %s1969_s25 }
 0x619   : > { %s2661_s23 = smov %s2665_s28  ;;  %s2662_s24 = smov %s2669_s29 }
 0x61a   :  { %16 = sbr.rel (!%p14_p9) target bundleno = 10 (0xa), region = 146 }
 0x61b   : > { %s2663_s25 = smov %s2655_s2 }
 0x61f   :  { %1442 = vsyncpa [#allocation3], 1 }
 0x620   :  { %1444 = vsyncpa [#allocation3 + $0x1], 1 }

</bundles_post_ra>
